<compile_context>
chip_gen: v6e
topology: v6e:2x2x1
jax: 0.10.0
libtpu: 0.0.40
codegen_flags: <defaults>
</compile_context>

<pallas_src>
import functools
import math

import jax
import jax.numpy as jnp
from jax import lax
from jax.experimental import pallas as pl
from jax.experimental.pallas import tpu as pltpu

# ---------------------------------------------------------------------------
# Config (small, consistent with a BERT-style encoder)
# ---------------------------------------------------------------------------
VOCAB = 32
MAX_POS = 16
TYPE_VOCAB = 2
HIDDEN = 32
NUM_HEADS = 2
HEAD_DIM = HIDDEN // NUM_HEADS
INTERMEDIATE = 64
NUM_LAYERS = 2
NUM_CHR_LABELS = 4
NUM_TEL_LABELS = 3
LN_EPS = 1e-12

BATCH = 2
SEQ = 8
BS = BATCH * SEQ
LANES = 128


def _round_up(n, m):
    return (n + m - 1) // m * m


# ---------------------------------------------------------------------------
# Params slab layout (single f32 (TOTAL_ROWS, 128) array; every block starts at
# column 0 and at a statically known row; weight blocks start on 8-row bounds)
# ---------------------------------------------------------------------------
ROW_WORD = 0                                # (VOCAB, HIDDEN)
ROW_POS = ROW_WORD + VOCAB                  # (MAX_POS, HIDDEN)
ROW_TYPE = ROW_POS + MAX_POS                # (1, HIDDEN)  -- token_type 0 row
ROW_EMB_LN_G = ROW_TYPE + 1
ROW_EMB_LN_B = ROW_EMB_LN_G + 1
ROW_LAYER0 = _round_up(ROW_EMB_LN_B + 1, 8)

# per-layer relative row offsets
L_WQ, L_WK, L_WV, L_WO = 0, HIDDEN, 2 * HIDDEN, 3 * HIDDEN   # each (HIDDEN, HIDDEN)
L_W1 = 4 * HIDDEN                                            # (HIDDEN, INTERMEDIATE)
L_W2 = L_W1 + HIDDEN                                         # (INTERMEDIATE, HIDDEN)
L_VEC = _round_up(L_W2 + INTERMEDIATE, 8)
(L_BQ, L_BK, L_BV, L_BO, L_LN1G, L_LN1B,
 L_B1, L_B2, L_LN2G, L_LN2B) = tuple(L_VEC + i for i in range(10))
LAYER_ROWS = _round_up(L_VEC + 10, 8)

ROW_WP = ROW_LAYER0 + NUM_LAYERS * LAYER_ROWS               # (HIDDEN, HIDDEN)
ROW_BP = ROW_WP + HIDDEN                                    # (1, HIDDEN)
ROW_BH = ROW_BP + 1                                         # (1, 128) padded head bias
ROW_WH = _round_up(ROW_BH + 1, 8)                           # (HIDDEN, 128) padded head W
TOTAL_ROWS = _round_up(ROW_WH + HIDDEN, 8)

# ---------------------------------------------------------------------------
# Inputs slab layout (single int32 (IN_ROWS, 128) array)
# ---------------------------------------------------------------------------
IN_COL_IDS = 0                               # rows 0..BS-1, col 0  : input_ids (column)
IN_COL_MASK = 8                              # rows 0..B-1, cols 8..8+SEQ-1 : attention mask
IN_COL_LCHR = IN_COL_MASK + _round_up(SEQ, 8)   # rows 0..B-1 : labels_chr (column)
IN_COL_LTEL = IN_COL_LCHR + 1                   # rows 0..B-1 : labels_tel (column)
IN_ROWS = max(_round_up(BS, 8), 8)

OUT_ROWS = max(_round_up(BATCH + 1, 8), 8)   # rows 0..B-1: logits; row B, col 0: loss


# ---------------------------------------------------------------------------
# In-kernel helpers (pure value math, f32)
# ---------------------------------------------------------------------------
def _layer_norm(x, g, b):
    mu = jnp.mean(x, axis=-1, keepdims=True)
    var = jnp.mean((x - mu) ** 2, axis=-1, keepdims=True)
    return (x - mu) * lax.rsqrt(var + LN_EPS) * g + b


def _cross_entropy_mean(logits, labels_col):
    """Mean CE over the batch (nn.CrossEntropyLoss default reduction) -> (1,1)."""
    m = jnp.max(logits, axis=-1, keepdims=True)
    lse = jnp.log(jnp.sum(jnp.exp(logits - m), axis=-1, keepdims=True)) + m
    logp = logits - lse
    classes = lax.broadcasted_iota(jnp.int32, logits.shape, 1)
    onehot = (labels_col == classes).astype(jnp.float32)
    nll = -jnp.sum(onehot * logp, axis=-1, keepdims=True)          # (B, 1)
    return jnp.sum(nll, axis=0, keepdims=True) * (1.0 / logits.shape[0])


# ---------------------------------------------------------------------------
# The single fused forward kernel (no grid: one call, everything VMEM-resident)
# ---------------------------------------------------------------------------
def fused_forward_kernel(in_ref, params_ref, out_ref, *, compute_loss):
    f32 = jnp.float32
    bf16 = jnp.bfloat16
    scale = 1.0 / math.sqrt(HEAD_DIM)

    def blk(r, nrows, ncols=HIDDEN):
        return params_ref[r:r + nrows, 0:ncols]

    def vec(r, ncols=HIDDEN):
        return params_ref[r:r + 1, 0:ncols]

    def mm(a, b):
        # bf16 MXU inputs, f32 accumulation
        return jnp.dot(a.astype(bf16), b.astype(bf16), preferred_element_type=f32)

    # ---- BERT embeddings: token gather as a one-hot MXU matmul ----
    ids = in_ref[0:BS, IN_COL_IDS:IN_COL_IDS + 1]                     # (BS, 1) int32
    tok_oh = (ids == lax.broadcasted_iota(jnp.int32, (BS, VOCAB), 1)).astype(f32)
    x = mm(tok_oh, blk(ROW_WORD, VOCAB, HIDDEN))                      # (BS, H) f32

    pos = blk(ROW_POS, SEQ, HIDDEN)                                   # (S, H)
    x = (x.reshape(BATCH, SEQ, HIDDEN) + pos[None, :, :]).reshape(BS, HIDDEN)
    x = x + vec(ROW_TYPE)                                             # token_type_ids == 0
    x = _layer_norm(x, vec(ROW_EMB_LN_G), vec(ROW_EMB_LN_B))

    # additive attention mask (shared across heads), kept in f32
    mask = in_ref[0:BATCH, IN_COL_MASK:IN_COL_MASK + SEQ].astype(f32)  # (B, S)
    mask_add = (1.0 - mask) * -1e9

    # ---- transformer layers (Python-unrolled; weights sliced from the slab) ----
    for l in range(NUM_LAYERS):
        base = ROW_LAYER0 + l * LAYER_ROWS

        q = mm(x, blk(base + L_WQ, HIDDEN)) + vec(base + L_BQ)         # (BS, H)
        k = mm(x, blk(base + L_WK, HIDDEN)) + vec(base + L_BK)
        v = mm(x, blk(base + L_WV, HIDDEN)) + vec(base + L_BV)

        attn_out = jnp.zeros((BS, HIDDEN), f32) + vec(base + L_BO)
        for h in range(NUM_HEADS):
            c0 = h * HEAD_DIM
            qh = q[:, c0:c0 + HEAD_DIM].reshape(BATCH, SEQ, HEAD_DIM)  # (B, S, Dh)
            kh = k[:, c0:c0 + HEAD_DIM].reshape(BATCH, SEQ, HEAD_DIM)
            vh = v[:, c0:c0 + HEAD_DIM].reshape(BATCH, SEQ, HEAD_DIM)
            # batched scores over the batch dim: one MXU contraction per head
            s = lax.dot_general(qh.astype(bf16), kh.astype(bf16),
                                (((2,), (2,)), ((0,), (0,))),
                                preferred_element_type=f32) * scale    # (B, S, S) f32
            s = s + mask_add[:, None, :]
            s = s - jnp.max(s, axis=-1, keepdims=True)
            p = jnp.exp(s)
            p = p / jnp.sum(p, axis=-1, keepdims=True)                 # f32 softmax
            ctx = lax.dot_general(p.astype(bf16), vh.astype(bf16),
                                  (((2,), (1,)), ((0,), (0,))),
                                  preferred_element_type=f32)          # (B, S, Dh)
            # per-head output projection (row slice of Wo) summed -> no lane concat
            wo_h = blk(base + L_WO + c0, HEAD_DIM, HIDDEN)             # (Dh, H)
            attn_out = attn_out + mm(ctx.reshape(BS, HEAD_DIM), wo_h)

        x = _layer_norm(x + attn_out, vec(base + L_LN1G), vec(base + L_LN1B))

        hmid = mm(x, blk(base + L_W1, HIDDEN, INTERMEDIATE)) + vec(base + L_B1, INTERMEDIATE)
        hmid = jax.nn.gelu(hmid, approximate=True)   # TODO(synk): erf-GELU in HF BERT
        ffn = mm(hmid, blk(base + L_W2, INTERMEDIATE, HIDDEN)) + vec(base + L_B2)
        x = _layer_norm(x + ffn, vec(base + L_LN2G), vec(base + L_LN2B))

    # ---- pooler: tanh(Linear(CLS)); CLS rows gathered via reshape + index ----
    cls = x.reshape(BATCH, SEQ, HIDDEN)[:, 0, :]                       # (B, H)
    pooled = jnp.tanh(mm(cls, blk(ROW_WP, HIDDEN)) + vec(ROW_BP))

    # ---- dropout(pooled): identity in eval mode ----

    # ---- task heads fused into one lane-padded (H, 128) matmul ----
    logits_all = mm(pooled, blk(ROW_WH, HIDDEN, LANES)) + vec(ROW_BH, LANES)  # (B, 128)

    # ---- summed cross-entropy loss ----
    if compute_loss:
        lab_chr = in_ref[0:BATCH, IN_COL_LCHR:IN_COL_LCHR + 1]         # (B, 1) int32
        lab_tel = in_ref[0:BATCH, IN_COL_LTEL:IN_COL_LTEL + 1]
        loss_chr = _cross_entropy_mean(logits_all[:, 0:NUM_CHR_LABELS], lab_chr)
        loss_tel = _cross_entropy_mean(
            logits_all[:, NUM_CHR_LABELS:NUM_CHR_LABELS + NUM_TEL_LABELS], lab_tel)
        loss = loss_chr + loss_tel                                      # (1, 1)
        pad_rows = jnp.broadcast_to(loss, (OUT_ROWS - BATCH, LANES))
    else:
        pad_rows = jnp.zeros((OUT_ROWS - BATCH, LANES), f32)

    # single unmasked, lane-dense (8, 128) store
    out_ref[...] = jnp.concatenate([logits_all, pad_rows], axis=0)


# ---------------------------------------------------------------------------
# Deterministic parameter init (mirrors the shapes implied by __init__)
# ---------------------------------------------------------------------------
def init_params(key):
    def nrm(k, shape, scl=0.02):
        return (scl * jax.random.normal(k, shape)).astype(jnp.float32)

    keys = iter(jax.random.split(key, 128))
    params = {
        "word_emb": nrm(next(keys), (VOCAB, HIDDEN)),
        "pos_emb": nrm(next(keys), (MAX_POS, HIDDEN)),
        "type_emb": nrm(next(keys), (TYPE_VOCAB, HIDDEN)),
        "emb_ln_g": jnp.ones((HIDDEN,), jnp.float32),
        "emb_ln_b": jnp.zeros((HIDDEN,), jnp.float32),
        "layers": [],
        "wp": nrm(next(keys), (HIDDEN, HIDDEN)),
        "bp": jnp.zeros((HIDDEN,), jnp.float32),
        "w_chr": nrm(next(keys), (HIDDEN, NUM_CHR_LABELS)),
        "b_chr": jnp.zeros((NUM_CHR_LABELS,), jnp.float32),
        "w_tel": nrm(next(keys), (HIDDEN, NUM_TEL_LABELS)),
        "b_tel": jnp.zeros((NUM_TEL_LABELS,), jnp.float32),
    }
    for _ in range(NUM_LAYERS):
        params["layers"].append({
            "wq": nrm(next(keys), (HIDDEN, HIDDEN)), "bq": jnp.zeros((HIDDEN,), jnp.float32),
            "wk": nrm(next(keys), (HIDDEN, HIDDEN)), "bk": jnp.zeros((HIDDEN,), jnp.float32),
            "wv": nrm(next(keys), (HIDDEN, HIDDEN)), "bv": jnp.zeros((HIDDEN,), jnp.float32),
            "wo": nrm(next(keys), (HIDDEN, HIDDEN)), "bo": jnp.zeros((HIDDEN,), jnp.float32),
            "ln1_g": jnp.ones((HIDDEN,), jnp.float32), "ln1_b": jnp.zeros((HIDDEN,), jnp.float32),
            "w1": nrm(next(keys), (HIDDEN, INTERMEDIATE)), "b1": jnp.zeros((INTERMEDIATE,), jnp.float32),
            "w2": nrm(next(keys), (INTERMEDIATE, HIDDEN)), "b2": jnp.zeros((HIDDEN,), jnp.float32),
            "ln2_g": jnp.ones((HIDDEN,), jnp.float32), "ln2_b": jnp.zeros((HIDDEN,), jnp.float32),
        })
    return params


def pack_params(params):
    """One-time packing of every weight into a single (TOTAL_ROWS, 128) f32 slab."""
    slab = jnp.zeros((TOTAL_ROWS, LANES), jnp.float32)

    def put(s, r, block):
        block = jnp.asarray(block, jnp.float32)
        if block.ndim == 1:
            block = block[None, :]
        return s.at[r:r + block.shape[0], 0:block.shape[1]].set(block)

    slab = put(slab, ROW_WORD, params["word_emb"])
    slab = put(slab, ROW_POS, params["pos_emb"])
    slab = put(slab, ROW_TYPE, params["type_emb"][0])
    slab = put(slab, ROW_EMB_LN_G, params["emb_ln_g"])
    slab = put(slab, ROW_EMB_LN_B, params["emb_ln_b"])
    for l, lp in enumerate(params["layers"]):
        base = ROW_LAYER0 + l * LAYER_ROWS
        slab = put(slab, base + L_WQ, lp["wq"])
        slab = put(slab, base + L_WK, lp["wk"])
        slab = put(slab, base + L_WV, lp["wv"])
        slab = put(slab, base + L_WO, lp["wo"])
        slab = put(slab, base + L_W1, lp["w1"])
        slab = put(slab, base + L_W2, lp["w2"])
        slab = put(slab, base + L_BQ, lp["bq"])
        slab = put(slab, base + L_BK, lp["bk"])
        slab = put(slab, base + L_BV, lp["bv"])
        slab = put(slab, base + L_BO, lp["bo"])
        slab = put(slab, base + L_LN1G, lp["ln1_g"])
        slab = put(slab, base + L_LN1B, lp["ln1_b"])
        slab = put(slab, base + L_B1, lp["b1"])
        slab = put(slab, base + L_B2, lp["b2"])
        slab = put(slab, base + L_LN2G, lp["ln2_g"])
        slab = put(slab, base + L_LN2B, lp["ln2_b"])
    slab = put(slab, ROW_WP, params["wp"])
    slab = put(slab, ROW_BP, params["bp"])
    slab = put(slab, ROW_WH, jnp.concatenate([params["w_chr"], params["w_tel"]], axis=1))
    slab = put(slab, ROW_BH, jnp.concatenate([params["b_chr"], params["b_tel"]]))
    return slab


# ---------------------------------------------------------------------------
# Forward pass (MultiTaskDNABERT.forward) — one gridless pallas_call
# ---------------------------------------------------------------------------
def multitask_dnabert_forward(params_slab, input_ids, attention_mask,
                              labels_chr=None, labels_tel=None):
    B, S = input_ids.shape
    assert B == BATCH and S == SEQ

    inp = jnp.zeros((IN_ROWS, LANES), jnp.int32)
    inp = inp.at[0:B * S, IN_COL_IDS].set(input_ids.reshape(-1).astype(jnp.int32))
    inp = inp.at[0:B, IN_COL_MASK:IN_COL_MASK + S].set(attention_mask.astype(jnp.int32))
    compute_loss = labels_chr is not None and labels_tel is not None
    if compute_loss:
        inp = inp.at[0:B, IN_COL_LCHR].set(labels_chr.astype(jnp.int32))
        inp = inp.at[0:B, IN_COL_LTEL].set(labels_tel.astype(jnp.int32))

    kern = functools.partial(fused_forward_kernel, compute_loss=compute_loss)
    out = pl.pallas_call(
        kern,
        out_shape=jax.ShapeDtypeStruct((OUT_ROWS, LANES), jnp.float32),
        in_specs=[pl.BlockSpec(memory_space=pltpu.MemorySpace.VMEM),
                  pl.BlockSpec(memory_space=pltpu.MemorySpace.VMEM)],
        out_specs=pl.BlockSpec(memory_space=pltpu.MemorySpace.VMEM),
        cost_estimate=pl.CostEstimate(flops=600_000, transcendentals=5_000,
                                      bytes_accessed=340_000),
    )(inp, params_slab)

    logits_chr = out[0:B, 0:NUM_CHR_LABELS]
    logits_tel = out[0:B, NUM_CHR_LABELS:NUM_CHR_LABELS + NUM_TEL_LABELS]
    loss = out[B, 0] if compute_loss else None
    return {"loss": loss, "logits_chr": logits_chr, "logits_tel": logits_tel}


# ---------------------------------------------------------------------------
# Pure-JAX f32 reference (for a tolerance check of the bf16-matmul kernel)
# ---------------------------------------------------------------------------
def _ln_ref(x, g, b):
    mu = jnp.mean(x, axis=-1, keepdims=True)
    var = jnp.mean((x - mu) ** 2, axis=-1, keepdims=True)
    return (x - mu) * lax.rsqrt(var + LN_EPS) * g + b


def reference_forward(params, input_ids, attention_mask, labels_chr=None, labels_tel=None):
    B, S = input_ids.shape
    scale = 1.0 / math.sqrt(HEAD_DIM)
    x = params["word_emb"][input_ids]
    x = x + params["pos_emb"][:S][None, :, :]
    x = x + params["type_emb"][0][None, None, :]
    x = _ln_ref(x, params["emb_ln_g"], params["emb_ln_b"])
    mask_add = (1.0 - attention_mask.astype(jnp.float32)) * -1e9
    for lp in params["layers"]:
        q = x @ lp["wq"] + lp["bq"]
        k = x @ lp["wk"] + lp["bk"]
        v = x @ lp["wv"] + lp["bv"]
        split = lambda t: t.reshape(B, S, NUM_HEADS, HEAD_DIM).transpose(0, 2, 1, 3)
        qh, kh, vh = split(q), split(k), split(v)
        s = jnp.einsum("bhqd,bhkd->bhqk", qh, kh) * scale + mask_add[:, None, None, :]
        p = jax.nn.softmax(s, axis=-1)
        ctx = jnp.einsum("bhqk,bhkd->bhqd", p, vh).transpose(0, 2, 1, 3).reshape(B, S, HIDDEN)
        x = _ln_ref(x + ctx @ lp["wo"] + lp["bo"], lp["ln1_g"], lp["ln1_b"])
        h = jax.nn.gelu(x @ lp["w1"] + lp["b1"], approximate=True)
        x = _ln_ref(x + h @ lp["w2"] + lp["b2"], lp["ln2_g"], lp["ln2_b"])
    pooled = jnp.tanh(x[:, 0, :] @ params["wp"] + params["bp"])
    logits_chr = pooled @ params["w_chr"] + params["b_chr"]
    logits_tel = pooled @ params["w_tel"] + params["b_tel"]
    loss = None
    if labels_chr is not None and labels_tel is not None:
        def ce(logits, labels):
            logp = jax.nn.log_softmax(logits, axis=-1)
            return -jnp.mean(jnp.take_along_axis(logp, labels[:, None], axis=-1))
        loss = ce(logits_chr, labels_chr) + ce(logits_tel, labels_tel)
    return {"loss": loss, "logits_chr": logits_chr, "logits_tel": logits_tel}


# ---------------------------------------------------------------------------
if __name__ == "__main__":
    key = jax.random.PRNGKey(0)
    k_params, k_ids = jax.random.split(key, 2)

    params = init_params(k_params)
    params_slab = pack_params(params)

    input_ids = jax.random.randint(k_ids, (BATCH, SEQ), 0, VOCAB, dtype=jnp.int32)
    attention_mask = jnp.ones((BATCH, SEQ), dtype=jnp.int32).at[:, SEQ - 2:].set(0)
    labels_chr = jnp.array([1, 3], dtype=jnp.int32)
    labels_tel = jnp.array([0, 2], dtype=jnp.int32)

    out = multitask_dnabert_forward(params_slab, input_ids, attention_mask,
                                    labels_chr=labels_chr, labels_tel=labels_tel)
    jax.block_until_ready(out["logits_chr"])
    jax.block_until_ready(out["logits_tel"])
    jax.block_until_ready(out["loss"])

    assert out["logits_chr"].shape == (BATCH, NUM_CHR_LABELS)
    assert out["logits_tel"].shape == (BATCH, NUM_TEL_LABELS)
    assert out["loss"].shape == ()

    # tolerance check against a pure-JAX f32 reference (bf16 MXU inputs in kernel)
    ref = reference_forward(params, input_ids, attention_mask, labels_chr, labels_tel)
    tol = 1e-1
    assert float(jnp.max(jnp.abs(out["logits_chr"] - ref["logits_chr"]))) < tol
    assert float(jnp.max(jnp.abs(out["logits_tel"] - ref["logits_tel"]))) < tol
    assert float(jnp.abs(out["loss"] - ref["loss"])) < tol

    # inference path (no labels) exercises the loss-free specialization
    out_nl = multitask_dnabert_forward(params_slab, input_ids, attention_mask)
    jax.block_until_ready(out_nl["logits_chr"])
    assert out_nl["loss"] is None

    print("KERNEL_OK")
</pallas_src>

<mosaic_0001>
module attributes {stable_mosaic.version = 11 : i64} {
  func.func @fused_forward_kernel(%arg0: memref<16x128xi32, #tpu.memory_space<vmem>>, %arg1: memref<608x128xf32, #tpu.memory_space<vmem>>, %arg2: memref<8x128xf32, #tpu.memory_space<vmem>>) attributes {dimension_semantics = [], scalar_prefetch = 0 : i64, scratch_operands = 0 : i64, tpu.core_type = #tpu.core_type<tc>} {
    %c0 = arith.constant 0 : index
    %c0_0 = arith.constant 0 : index
    %0 = vector.load %arg0[%c0, %c0_0] : memref<16x128xi32, #tpu.memory_space<vmem>>, vector<16x1xi32>
    %1 = tpu.iota {dimensions = array<i32: 1>} : vector<16x32xi32>
    %2 = vector.broadcast %0 : vector<16x1xi32> to vector<16x32xi32>
    %3 = arith.cmpi eq, %2, %1 : vector<16x32xi32>
    %4 = arith.extui %3 : vector<16x32xi1> to vector<16x32xi32>
    %5 = arith.sitofp %4 : vector<16x32xi32> to vector<16x32xf32>
    %c0_1 = arith.constant 0 : index
    %c0_2 = arith.constant 0 : index
    %6 = vector.load %arg1[%c0_1, %c0_2] : memref<608x128xf32, #tpu.memory_space<vmem>>, vector<32x32xf32>
    %7 = arith.truncf %5 : vector<16x32xf32> to vector<16x32xbf16>
    %8 = arith.truncf %6 : vector<32x32xf32> to vector<32x32xbf16>
    %cst = arith.constant dense<0.000000e+00> : vector<16x32xf32>
    %9 = tpu.matmul %7, %8, %cst {dimension_numbers = #tpu.dot_dimension_numbers<[1], [0], [0], [1], [0, 0, 1, 1], [], []>} : vector<16x32xbf16>, vector<32x32xbf16>, vector<16x32xf32> -> vector<16x32xf32>
    %c32 = arith.constant 32 : index
    %c0_3 = arith.constant 0 : index
    %10 = vector.load %arg1[%c32, %c0_3] : memref<608x128xf32, #tpu.memory_space<vmem>>, vector<8x32xf32>
    %11 = vector.shape_cast %9 : vector<16x32xf32> to vector<2x8x32xf32>
    %12 = vector.shape_cast %10 : vector<8x32xf32> to vector<1x8x32xf32>
    %13 = vector.broadcast %12 : vector<1x8x32xf32> to vector<2x8x32xf32>
    %14 = arith.addf %11, %13 : vector<2x8x32xf32>
    %15 = vector.shape_cast %14 : vector<2x8x32xf32> to vector<16x32xf32>
    %c48 = arith.constant 48 : index
    %c0_4 = arith.constant 0 : index
    %16 = vector.load %arg1[%c48, %c0_4] : memref<608x128xf32, #tpu.memory_space<vmem>>, vector<1x32xf32>
    %17 = vector.broadcast %16 : vector<1x32xf32> to vector<16x32xf32>
    %18 = arith.addf %15, %17 : vector<16x32xf32>
    %c49 = arith.constant 49 : index
    %c0_5 = arith.constant 0 : index
    %19 = vector.load %arg1[%c49, %c0_5] : memref<608x128xf32, #tpu.memory_space<vmem>>, vector<1x32xf32>
    %c50 = arith.constant 50 : index
    %c0_6 = arith.constant 0 : index
    %20 = vector.load %arg1[%c50, %c0_6] : memref<608x128xf32, #tpu.memory_space<vmem>>, vector<1x32xf32>
    %cst_7 = arith.constant dense<0.000000e+00> : vector<16xf32>
    %21 = vector.multi_reduction <add>, %18, %cst_7 [1] : vector<16x32xf32> to vector<16xf32>
    %22 = vector.shape_cast %21 : vector<16xf32> to vector<16x1xf32>
    %cst_8 = arith.constant 3.200000e+01 : f32
    %23 = vector.broadcast %cst_8 : f32 to vector<16x1xf32>
    %24 = arith.divf %22, %23 : vector<16x1xf32>
    %25 = vector.broadcast %24 : vector<16x1xf32> to vector<16x32xf32>
    %26 = arith.subf %18, %25 : vector<16x32xf32>
    %27 = arith.mulf %26, %26 : vector<16x32xf32>
    %cst_9 = arith.constant dense<0.000000e+00> : vector<16xf32>
    %28 = vector.multi_reduction <add>, %27, %cst_9 [1] : vector<16x32xf32> to vector<16xf32>
    %29 = vector.shape_cast %28 : vector<16xf32> to vector<16x1xf32>
    %cst_10 = arith.constant 3.200000e+01 : f32
    %30 = vector.broadcast %cst_10 : f32 to vector<16x1xf32>
    %31 = arith.divf %29, %30 : vector<16x1xf32>
    %32 = vector.broadcast %24 : vector<16x1xf32> to vector<16x32xf32>
    %33 = arith.subf %18, %32 : vector<16x32xf32>
    %cst_11 = arith.constant 9.99999996E-13 : f32
    %34 = vector.broadcast %cst_11 : f32 to vector<16x1xf32>
    %35 = arith.addf %31, %34 : vector<16x1xf32>
    %36 = math.rsqrt %35 : vector<16x1xf32>
    %37 = vector.broadcast %36 : vector<16x1xf32> to vector<16x32xf32>
    %38 = arith.mulf %33, %37 : vector<16x32xf32>
    %39 = vector.broadcast %19 : vector<1x32xf32> to vector<16x32xf32>
    %40 = arith.mulf %38, %39 : vector<16x32xf32>
    %41 = vector.broadcast %20 : vector<1x32xf32> to vector<16x32xf32>
    %42 = arith.addf %40, %41 : vector<16x32xf32>
    %c0_12 = arith.constant 0 : index
    %c8 = arith.constant 8 : index
    %43 = vector.load %arg0[%c0_12, %c8] : memref<16x128xi32, #tpu.memory_space<vmem>>, vector<2x8xi32>
    %44 = arith.sitofp %43 : vector<2x8xi32> to vector<2x8xf32>
    %cst_13 = arith.constant 1.000000e+00 : f32
    %45 = vector.broadcast %cst_13 : f32 to vector<2x8xf32>
    %46 = arith.subf %45, %44 : vector<2x8xf32>
    %cst_14 = arith.constant -1.000000e+09 : f32
    %47 = vector.broadcast %cst_14 : f32 to vector<2x8xf32>
    %48 = arith.mulf %46, %47 : vector<2x8xf32>
    %c56 = arith.constant 56 : index
    %c0_15 = arith.constant 0 : index
    %49 = vector.load %arg1[%c56, %c0_15] : memref<608x128xf32, #tpu.memory_space<vmem>>, vector<32x32xf32>
    %50 = arith.truncf %42 : vector<16x32xf32> to vector<16x32xbf16>
    %51 = arith.truncf %49 : vector<32x32xf32> to vector<32x32xbf16>
    %cst_16 = arith.constant dense<0.000000e+00> : vector<16x32xf32>
    %52 = tpu.matmul %50, %51, %cst_16 {dimension_numbers = #tpu.dot_dimension_numbers<[1], [0], [0], [1], [0, 0, 1, 1], [], []>} : vector<16x32xbf16>, vector<32x32xbf16>, vector<16x32xf32> -> vector<16x32xf32>
    %c280 = arith.constant 280 : index
    %c0_17 = arith.constant 0 : index
    %53 = vector.load %arg1[%c280, %c0_17] : memref<608x128xf32, #tpu.memory_space<vmem>>, vector<1x32xf32>
    %54 = vector.broadcast %53 : vector<1x32xf32> to vector<16x32xf32>
    %55 = arith.addf %52, %54 : vector<16x32xf32>
    %c88 = arith.constant 88 : index
    %c0_18 = arith.constant 0 : index
    %56 = vector.load %arg1[%c88, %c0_18] : memref<608x128xf32, #tpu.memory_space<vmem>>, vector<32x32xf32>
    %57 = arith.truncf %42 : vector<16x32xf32> to vector<16x32xbf16>
    %58 = arith.truncf %56 : vector<32x32xf32> to vector<32x32xbf16>
    %cst_19 = arith.constant dense<0.000000e+00> : vector<16x32xf32>
    %59 = tpu.matmul %57, %58, %cst_19 {dimension_numbers = #tpu.dot_dimension_numbers<[1], [0], [0], [1], [0, 0, 1, 1], [], []>} : vector<16x32xbf16>, vector<32x32xbf16>, vector<16x32xf32> -> vector<16x32xf32>
    %c281 = arith.constant 281 : index
    %c0_20 = arith.constant 0 : index
    %60 = vector.load %arg1[%c281, %c0_20] : memref<608x128xf32, #tpu.memory_space<vmem>>, vector<1x32xf32>
    %61 = vector.broadcast %60 : vector<1x32xf32> to vector<16x32xf32>
    %62 = arith.addf %59, %61 : vector<16x32xf32>
    %c120 = arith.constant 120 : index
    %c0_21 = arith.constant 0 : index
    %63 = vector.load %arg1[%c120, %c0_21] : memref<608x128xf32, #tpu.memory_space<vmem>>, vector<32x32xf32>
    %64 = arith.truncf %42 : vector<16x32xf32> to vector<16x32xbf16>
    %65 = arith.truncf %63 : vector<32x32xf32> to vector<32x32xbf16>
    %cst_22 = arith.constant dense<0.000000e+00> : vector<16x32xf32>
    %66 = tpu.matmul %64, %65, %cst_22 {dimension_numbers = #tpu.dot_dimension_numbers<[1], [0], [0], [1], [0, 0, 1, 1], [], []>} : vector<16x32xbf16>, vector<32x32xbf16>, vector<16x32xf32> -> vector<16x32xf32>
    %c282 = arith.constant 282 : index
    %c0_23 = arith.constant 0 : index
    %67 = vector.load %arg1[%c282, %c0_23] : memref<608x128xf32, #tpu.memory_space<vmem>>, vector<1x32xf32>
    %68 = vector.broadcast %67 : vector<1x32xf32> to vector<16x32xf32>
    %69 = arith.addf %66, %68 : vector<16x32xf32>
    %cst_24 = arith.constant 0.000000e+00 : f32
    %70 = vector.broadcast %cst_24 : f32 to vector<16x32xf32>
    %c283 = arith.constant 283 : index
    %c0_25 = arith.constant 0 : index
    %71 = vector.load %arg1[%c283, %c0_25] : memref<608x128xf32, #tpu.memory_space<vmem>>, vector<1x32xf32>
    %72 = vector.broadcast %71 : vector<1x32xf32> to vector<16x32xf32>
    %73 = arith.addf %70, %72 : vector<16x32xf32>
    %74 = vector.extract_strided_slice %55 {offsets = [0, 0], sizes = [16, 16], strides = [1, 1]} : vector<16x32xf32> to vector<16x16xf32>
    %75 = vector.shape_cast %74 : vector<16x16xf32> to vector<2x8x16xf32>
    %76 = vector.extract_strided_slice %62 {offsets = [0, 0], sizes = [16, 16], strides = [1, 1]} : vector<16x32xf32> to vector<16x16xf32>
    %77 = vector.shape_cast %76 : vector<16x16xf32> to vector<2x8x16xf32>
    %78 = vector.extract_strided_slice %69 {offsets = [0, 0], sizes = [16, 16], strides = [1, 1]} : vector<16x32xf32> to vector<16x16xf32>
    %79 = vector.shape_cast %78 : vector<16x16xf32> to vector<2x8x16xf32>
    %80 = arith.truncf %75 : vector<2x8x16xf32> to vector<2x8x16xbf16>
    %81 = arith.truncf %77 : vector<2x8x16xf32> to vector<2x8x16xbf16>
    %cst_26 = arith.constant dense<0.000000e+00> : vector<2x8x8xf32>
    %82 = tpu.matmul %80, %81, %cst_26 {dimension_numbers = #tpu.dot_dimension_numbers<[2], [2], [1], [1], [0, 0, 0, 1, 1, 1], [0], [0]>} : vector<2x8x16xbf16>, vector<2x8x16xbf16>, vector<2x8x8xf32> -> vector<2x8x8xf32>
    %cst_27 = arith.constant 2.500000e-01 : f32
    %83 = vector.broadcast %cst_27 : f32 to vector<2x8x8xf32>
    %84 = arith.mulf %82, %83 : vector<2x8x8xf32>
    %85 = vector.shape_cast %48 : vector<2x8xf32> to vector<2x1x8xf32>
    %86 = vector.broadcast %85 : vector<2x1x8xf32> to vector<2x8x8xf32>
    %87 = arith.addf %84, %86 : vector<2x8x8xf32>
    %cst_28 = arith.constant dense<0xFF800000> : vector<2x8xf32>
    %88 = vector.multi_reduction <maximumf>, %87, %cst_28 [2] : vector<2x8x8xf32> to vector<2x8xf32>
    %89 = vector.shape_cast %88 : vector<2x8xf32> to vector<2x8x1xf32>
    %90 = vector.broadcast %89 : vector<2x8x1xf32> to vector<2x8x8xf32>
    %91 = arith.subf %87, %90 : vector<2x8x8xf32>
    %92 = math.exp %91 : vector<2x8x8xf32>
    %cst_29 = arith.constant dense<0.000000e+00> : vector<2x8xf32>
    %93 = vector.multi_reduction <add>, %92, %cst_29 [2] : vector<2x8x8xf32> to vector<2x8xf32>
    %94 = vector.shape_cast %93 : vector<2x8xf32> to vector<2x8x1xf32>
    %95 = vector.broadcast %94 : vector<2x8x1xf32> to vector<2x8x8xf32>
    %96 = arith.divf %92, %95 : vector<2x8x8xf32>
    %97 = arith.truncf %96 : vector<2x8x8xf32> to vector<2x8x8xbf16>
    %98 = arith.truncf %79 : vector<2x8x16xf32> to vector<2x8x16xbf16>
    %cst_30 = arith.constant dense<0.000000e+00> : vector<2x8x16xf32>
    %99 = tpu.matmul %97, %98, %cst_30 {dimension_numbers = #tpu.dot_dimension_numbers<[2], [1], [1], [2], [0, 0, 0, 1, 1, 2], [0], [0]>} : vector<2x8x8xbf16>, vector<2x8x16xbf16>, vector<2x8x16xf32> -> vector<2x8x16xf32>
    %c152 = arith.constant 152 : index
    %c0_31 = arith.constant 0 : index
    %100 = vector.load %arg1[%c152, %c0_31] : memref<608x128xf32, #tpu.memory_space<vmem>>, vector<16x32xf32>
    %101 = vector.shape_cast %99 : vector<2x8x16xf32> to vector<16x16xf32>
    %102 = arith.truncf %101 : vector<16x16xf32> to vector<16x16xbf16>
    %103 = arith.truncf %100 : vector<16x32xf32> to vector<16x32xbf16>
    %cst_32 = arith.constant dense<0.000000e+00> : vector<16x32xf32>
    %104 = tpu.matmul %102, %103, %cst_32 {dimension_numbers = #tpu.dot_dimension_numbers<[1], [0], [0], [1], [0, 0, 1, 1], [], []>} : vector<16x16xbf16>, vector<16x32xbf16>, vector<16x32xf32> -> vector<16x32xf32>
    %105 = arith.addf %73, %104 : vector<16x32xf32>
    %106 = vector.extract_strided_slice %55 {offsets = [0, 16], sizes = [16, 16], strides = [1, 1]} : vector<16x32xf32> to vector<16x16xf32>
    %107 = vector.shape_cast %106 : vector<16x16xf32> to vector<2x8x16xf32>
    %108 = vector.extract_strided_slice %62 {offsets = [0, 16], sizes = [16, 16], strides = [1, 1]} : vector<16x32xf32> to vector<16x16xf32>
    %109 = vector.shape_cast %108 : vector<16x16xf32> to vector<2x8x16xf32>
    %110 = vector.extract_strided_slice %69 {offsets = [0, 16], sizes = [16, 16], strides = [1, 1]} : vector<16x32xf32> to vector<16x16xf32>
    %111 = vector.shape_cast %110 : vector<16x16xf32> to vector<2x8x16xf32>
    %112 = arith.truncf %107 : vector<2x8x16xf32> to vector<2x8x16xbf16>
    %113 = arith.truncf %109 : vector<2x8x16xf32> to vector<2x8x16xbf16>
    %cst_33 = arith.constant dense<0.000000e+00> : vector<2x8x8xf32>
    %114 = tpu.matmul %112, %113, %cst_33 {dimension_numbers = #tpu.dot_dimension_numbers<[2], [2], [1], [1], [0, 0, 0, 1, 1, 1], [0], [0]>} : vector<2x8x16xbf16>, vector<2x8x16xbf16>, vector<2x8x8xf32> -> vector<2x8x8xf32>
    %cst_34 = arith.constant 2.500000e-01 : f32
    %115 = vector.broadcast %cst_34 : f32 to vector<2x8x8xf32>
    %116 = arith.mulf %114, %115 : vector<2x8x8xf32>
    %117 = vector.shape_cast %48 : vector<2x8xf32> to vector<2x1x8xf32>
    %118 = vector.broadcast %117 : vector<2x1x8xf32> to vector<2x8x8xf32>
    %119 = arith.addf %116, %118 : vector<2x8x8xf32>
    %cst_35 = arith.constant dense<0xFF800000> : vector<2x8xf32>
    %120 = vector.multi_reduction <maximumf>, %119, %cst_35 [2] : vector<2x8x8xf32> to vector<2x8xf32>
    %121 = vector.shape_cast %120 : vector<2x8xf32> to vector<2x8x1xf32>
    %122 = vector.broadcast %121 : vector<2x8x1xf32> to vector<2x8x8xf32>
    %123 = arith.subf %119, %122 : vector<2x8x8xf32>
    %124 = math.exp %123 : vector<2x8x8xf32>
    %cst_36 = arith.constant dense<0.000000e+00> : vector<2x8xf32>
    %125 = vector.multi_reduction <add>, %124, %cst_36 [2] : vector<2x8x8xf32> to vector<2x8xf32>
    %126 = vector.shape_cast %125 : vector<2x8xf32> to vector<2x8x1xf32>
    %127 = vector.broadcast %126 : vector<2x8x1xf32> to vector<2x8x8xf32>
    %128 = arith.divf %124, %127 : vector<2x8x8xf32>
    %129 = arith.truncf %128 : vector<2x8x8xf32> to vector<2x8x8xbf16>
    %130 = arith.truncf %111 : vector<2x8x16xf32> to vector<2x8x16xbf16>
    %cst_37 = arith.constant dense<0.000000e+00> : vector<2x8x16xf32>
    %131 = tpu.matmul %129, %130, %cst_37 {dimension_numbers = #tpu.dot_dimension_numbers<[2], [1], [1], [2], [0, 0, 0, 1, 1, 2], [0], [0]>} : vector<2x8x8xbf16>, vector<2x8x16xbf16>, vector<2x8x16xf32> -> vector<2x8x16xf32>
    %c168 = arith.constant 168 : index
    %c0_38 = arith.constant 0 : index
    %132 = vector.load %arg1[%c168, %c0_38] : memref<608x128xf32, #tpu.memory_space<vmem>>, vector<16x32xf32>
    %133 = vector.shape_cast %131 : vector<2x8x16xf32> to vector<16x16xf32>
    %134 = arith.truncf %133 : vector<16x16xf32> to vector<16x16xbf16>
    %135 = arith.truncf %132 : vector<16x32xf32> to vector<16x32xbf16>
    %cst_39 = arith.constant dense<0.000000e+00> : vector<16x32xf32>
    %136 = tpu.matmul %134, %135, %cst_39 {dimension_numbers = #tpu.dot_dimension_numbers<[1], [0], [0], [1], [0, 0, 1, 1], [], []>} : vector<16x16xbf16>, vector<16x32xbf16>, vector<16x32xf32> -> vector<16x32xf32>
    %137 = arith.addf %105, %136 : vector<16x32xf32>
    %138 = arith.addf %42, %137 : vector<16x32xf32>
    %c284 = arith.constant 284 : index
    %c0_40 = arith.constant 0 : index
    %139 = vector.load %arg1[%c284, %c0_40] : memref<608x128xf32, #tpu.memory_space<vmem>>, vector<1x32xf32>
    %c285 = arith.constant 285 : index
    %c0_41 = arith.constant 0 : index
    %140 = vector.load %arg1[%c285, %c0_41] : memref<608x128xf32, #tpu.memory_space<vmem>>, vector<1x32xf32>
    %cst_42 = arith.constant dense<0.000000e+00> : vector<16xf32>
    %141 = vector.multi_reduction <add>, %138, %cst_42 [1] : vector<16x32xf32> to vector<16xf32>
    %142 = vector.shape_cast %141 : vector<16xf32> to vector<16x1xf32>
    %cst_43 = arith.constant 3.200000e+01 : f32
    %143 = vector.broadcast %cst_43 : f32 to vector<16x1xf32>
    %144 = arith.divf %142, %143 : vector<16x1xf32>
    %145 = vector.broadcast %144 : vector<16x1xf32> to vector<16x32xf32>
    %146 = arith.subf %138, %145 : vector<16x32xf32>
    %147 = arith.mulf %146, %146 : vector<16x32xf32>
    %cst_44 = arith.constant dense<0.000000e+00> : vector<16xf32>
    %148 = vector.multi_reduction <add>, %147, %cst_44 [1] : vector<16x32xf32> to vector<16xf32>
    %149 = vector.shape_cast %148 : vector<16xf32> to vector<16x1xf32>
    %cst_45 = arith.constant 3.200000e+01 : f32
    %150 = vector.broadcast %cst_45 : f32 to vector<16x1xf32>
    %151 = arith.divf %149, %150 : vector<16x1xf32>
    %152 = vector.broadcast %144 : vector<16x1xf32> to vector<16x32xf32>
    %153 = arith.subf %138, %152 : vector<16x32xf32>
    %cst_46 = arith.constant 9.99999996E-13 : f32
    %154 = vector.broadcast %cst_46 : f32 to vector<16x1xf32>
    %155 = arith.addf %151, %154 : vector<16x1xf32>
    %156 = math.rsqrt %155 : vector<16x1xf32>
    %157 = vector.broadcast %156 : vector<16x1xf32> to vector<16x32xf32>
    %158 = arith.mulf %153, %157 : vector<16x32xf32>
    %159 = vector.broadcast %139 : vector<1x32xf32> to vector<16x32xf32>
    %160 = arith.mulf %158, %159 : vector<16x32xf32>
    %161 = vector.broadcast %140 : vector<1x32xf32> to vector<16x32xf32>
    %162 = arith.addf %160, %161 : vector<16x32xf32>
    %c184 = arith.constant 184 : index
    %c0_47 = arith.constant 0 : index
    %163 = vector.load %arg1[%c184, %c0_47] : memref<608x128xf32, #tpu.memory_space<vmem>>, vector<32x64xf32>
    %164 = arith.truncf %162 : vector<16x32xf32> to vector<16x32xbf16>
    %165 = arith.truncf %163 : vector<32x64xf32> to vector<32x64xbf16>
    %cst_48 = arith.constant dense<0.000000e+00> : vector<16x64xf32>
    %166 = tpu.matmul %164, %165, %cst_48 {dimension_numbers = #tpu.dot_dimension_numbers<[1], [0], [0], [1], [0, 0, 1, 1], [], []>} : vector<16x32xbf16>, vector<32x64xbf16>, vector<16x64xf32> -> vector<16x64xf32>
    %c286 = arith.constant 286 : index
    %c0_49 = arith.constant 0 : index
    %167 = vector.load %arg1[%c286, %c0_49] : memref<608x128xf32, #tpu.memory_space<vmem>>, vector<1x64xf32>
    %168 = vector.broadcast %167 : vector<1x64xf32> to vector<16x64xf32>
    %169 = arith.addf %166, %168 : vector<16x64xf32>
    %170 = arith.mulf %169, %169 : vector<16x64xf32>
    %171 = arith.mulf %169, %170 : vector<16x64xf32>
    %cst_50 = arith.constant 4.471500e-02 : f32
    %172 = vector.broadcast %cst_50 : f32 to vector<16x64xf32>
    %173 = arith.mulf %172, %171 : vector<16x64xf32>
    %174 = arith.addf %169, %173 : vector<16x64xf32>
    %cst_51 = arith.constant 0.797884583 : f32
    %175 = vector.broadcast %cst_51 : f32 to vector<16x64xf32>
    %176 = arith.mulf %175, %174 : vector<16x64xf32>
    %177 = math.tanh %176 : vector<16x64xf32>
    %cst_52 = arith.constant 1.000000e+00 : f32
    %178 = vector.broadcast %cst_52 : f32 to vector<16x64xf32>
    %179 = arith.addf %178, %177 : vector<16x64xf32>
    %cst_53 = arith.constant 5.000000e-01 : f32
    %180 = vector.broadcast %cst_53 : f32 to vector<16x64xf32>
    %181 = arith.mulf %180, %179 : vector<16x64xf32>
    %182 = arith.mulf %169, %181 : vector<16x64xf32>
    %c216 = arith.constant 216 : index
    %c0_54 = arith.constant 0 : index
    %183 = vector.load %arg1[%c216, %c0_54] : memref<608x128xf32, #tpu.memory_space<vmem>>, vector<64x32xf32>
    %184 = arith.truncf %182 : vector<16x64xf32> to vector<16x64xbf16>
    %185 = arith.truncf %183 : vector<64x32xf32> to vector<64x32xbf16>
    %cst_55 = arith.constant dense<0.000000e+00> : vector<16x32xf32>
    %186 = tpu.matmul %184, %185, %cst_55 {dimension_numbers = #tpu.dot_dimension_numbers<[1], [0], [0], [1], [0, 0, 1, 1], [], []>} : vector<16x64xbf16>, vector<64x32xbf16>, vector<16x32xf32> -> vector<16x32xf32>
    %c287 = arith.constant 287 : index
    %c0_56 = arith.constant 0 : index
    %187 = vector.load %arg1[%c287, %c0_56] : memref<608x128xf32, #tpu.memory_space<vmem>>, vector<1x32xf32>
    %188 = vector.broadcast %187 : vector<1x32xf32> to vector<16x32xf32>
    %189 = arith.addf %186, %188 : vector<16x32xf32>
    %190 = arith.addf %162, %189 : vector<16x32xf32>
    %c288 = arith.constant 288 : index
    %c0_57 = arith.constant 0 : index
    %191 = vector.load %arg1[%c288, %c0_57] : memref<608x128xf32, #tpu.memory_space<vmem>>, vector<1x32xf32>
    %c289 = arith.constant 289 : index
    %c0_58 = arith.constant 0 : index
    %192 = vector.load %arg1[%c289, %c0_58] : memref<608x128xf32, #tpu.memory_space<vmem>>, vector<1x32xf32>
    %cst_59 = arith.constant dense<0.000000e+00> : vector<16xf32>
    %193 = vector.multi_reduction <add>, %190, %cst_59 [1] : vector<16x32xf32> to vector<16xf32>
    %194 = vector.shape_cast %193 : vector<16xf32> to vector<16x1xf32>
    %cst_60 = arith.constant 3.200000e+01 : f32
    %195 = vector.broadcast %cst_60 : f32 to vector<16x1xf32>
    %196 = arith.divf %194, %195 : vector<16x1xf32>
    %197 = vector.broadcast %196 : vector<16x1xf32> to vector<16x32xf32>
    %198 = arith.subf %190, %197 : vector<16x32xf32>
    %199 = arith.mulf %198, %198 : vector<16x32xf32>
    %cst_61 = arith.constant dense<0.000000e+00> : vector<16xf32>
    %200 = vector.multi_reduction <add>, %199, %cst_61 [1] : vector<16x32xf32> to vector<16xf32>
    %201 = vector.shape_cast %200 : vector<16xf32> to vector<16x1xf32>
    %cst_62 = arith.constant 3.200000e+01 : f32
    %202 = vector.broadcast %cst_62 : f32 to vector<16x1xf32>
    %203 = arith.divf %201, %202 : vector<16x1xf32>
    %204 = vector.broadcast %196 : vector<16x1xf32> to vector<16x32xf32>
    %205 = arith.subf %190, %204 : vector<16x32xf32>
    %cst_63 = arith.constant 9.99999996E-13 : f32
    %206 = vector.broadcast %cst_63 : f32 to vector<16x1xf32>
    %207 = arith.addf %203, %206 : vector<16x1xf32>
    %208 = math.rsqrt %207 : vector<16x1xf32>
    %209 = vector.broadcast %208 : vector<16x1xf32> to vector<16x32xf32>
    %210 = arith.mulf %205, %209 : vector<16x32xf32>
    %211 = vector.broadcast %191 : vector<1x32xf32> to vector<16x32xf32>
    %212 = arith.mulf %210, %211 : vector<16x32xf32>
    %213 = vector.broadcast %192 : vector<1x32xf32> to vector<16x32xf32>
    %214 = arith.addf %212, %213 : vector<16x32xf32>
    %c296 = arith.constant 296 : index
    %c0_64 = arith.constant 0 : index
    %215 = vector.load %arg1[%c296, %c0_64] : memref<608x128xf32, #tpu.memory_space<vmem>>, vector<32x32xf32>
    %216 = arith.truncf %214 : vector<16x32xf32> to vector<16x32xbf16>
    %217 = arith.truncf %215 : vector<32x32xf32> to vector<32x32xbf16>
    %cst_65 = arith.constant dense<0.000000e+00> : vector<16x32xf32>
    %218 = tpu.matmul %216, %217, %cst_65 {dimension_numbers = #tpu.dot_dimension_numbers<[1], [0], [0], [1], [0, 0, 1, 1], [], []>} : vector<16x32xbf16>, vector<32x32xbf16>, vector<16x32xf32> -> vector<16x32xf32>
    %c520 = arith.constant 520 : index
    %c0_66 = arith.constant 0 : index
    %219 = vector.load %arg1[%c520, %c0_66] : memref<608x128xf32, #tpu.memory_space<vmem>>, vector<1x32xf32>
    %220 = vector.broadcast %219 : vector<1x32xf32> to vector<16x32xf32>
    %221 = arith.addf %218, %220 : vector<16x32xf32>
    %c328 = arith.constant 328 : index
    %c0_67 = arith.constant 0 : index
    %222 = vector.load %arg1[%c328, %c0_67] : memref<608x128xf32, #tpu.memory_space<vmem>>, vector<32x32xf32>
    %223 = arith.truncf %214 : vector<16x32xf32> to vector<16x32xbf16>
    %224 = arith.truncf %222 : vector<32x32xf32> to vector<32x32xbf16>
    %cst_68 = arith.constant dense<0.000000e+00> : vector<16x32xf32>
    %225 = tpu.matmul %223, %224, %cst_68 {dimension_numbers = #tpu.dot_dimension_numbers<[1], [0], [0], [1], [0, 0, 1, 1], [], []>} : vector<16x32xbf16>, vector<32x32xbf16>, vector<16x32xf32> -> vector<16x32xf32>
    %c521 = arith.constant 521 : index
    %c0_69 = arith.constant 0 : index
    %226 = vector.load %arg1[%c521, %c0_69] : memref<608x128xf32, #tpu.memory_space<vmem>>, vector<1x32xf32>
    %227 = vector.broadcast %226 : vector<1x32xf32> to vector<16x32xf32>
    %228 = arith.addf %225, %227 : vector<16x32xf32>
    %c360 = arith.constant 360 : index
    %c0_70 = arith.constant 0 : index
    %229 = vector.load %arg1[%c360, %c0_70] : memref<608x128xf32, #tpu.memory_space<vmem>>, vector<32x32xf32>
    %230 = arith.truncf %214 : vector<16x32xf32> to vector<16x32xbf16>
    %231 = arith.truncf %229 : vector<32x32xf32> to vector<32x32xbf16>
    %cst_71 = arith.constant dense<0.000000e+00> : vector<16x32xf32>
    %232 = tpu.matmul %230, %231, %cst_71 {dimension_numbers = #tpu.dot_dimension_numbers<[1], [0], [0], [1], [0, 0, 1, 1], [], []>} : vector<16x32xbf16>, vector<32x32xbf16>, vector<16x32xf32> -> vector<16x32xf32>
    %c522 = arith.constant 522 : index
    %c0_72 = arith.constant 0 : index
    %233 = vector.load %arg1[%c522, %c0_72] : memref<608x128xf32, #tpu.memory_space<vmem>>, vector<1x32xf32>
    %234 = vector.broadcast %233 : vector<1x32xf32> to vector<16x32xf32>
    %235 = arith.addf %232, %234 : vector<16x32xf32>
    %cst_73 = arith.constant 0.000000e+00 : f32
    %236 = vector.broadcast %cst_73 : f32 to vector<16x32xf32>
    %c523 = arith.constant 523 : index
    %c0_74 = arith.constant 0 : index
    %237 = vector.load %arg1[%c523, %c0_74] : memref<608x128xf32, #tpu.memory_space<vmem>>, vector<1x32xf32>
    %238 = vector.broadcast %237 : vector<1x32xf32> to vector<16x32xf32>
    %239 = arith.addf %236, %238 : vector<16x32xf32>
    %240 = vector.extract_strided_slice %221 {offsets = [0, 0], sizes = [16, 16], strides = [1, 1]} : vector<16x32xf32> to vector<16x16xf32>
    %241 = vector.shape_cast %240 : vector<16x16xf32> to vector<2x8x16xf32>
    %242 = vector.extract_strided_slice %228 {offsets = [0, 0], sizes = [16, 16], strides = [1, 1]} : vector<16x32xf32> to vector<16x16xf32>
    %243 = vector.shape_cast %242 : vector<16x16xf32> to vector<2x8x16xf32>
    %244 = vector.extract_strided_slice %235 {offsets = [0, 0], sizes = [16, 16], strides = [1, 1]} : vector<16x32xf32> to vector<16x16xf32>
    %245 = vector.shape_cast %244 : vector<16x16xf32> to vector<2x8x16xf32>
    %246 = arith.truncf %241 : vector<2x8x16xf32> to vector<2x8x16xbf16>
    %247 = arith.truncf %243 : vector<2x8x16xf32> to vector<2x8x16xbf16>
    %cst_75 = arith.constant dense<0.000000e+00> : vector<2x8x8xf32>
    %248 = tpu.matmul %246, %247, %cst_75 {dimension_numbers = #tpu.dot_dimension_numbers<[2], [2], [1], [1], [0, 0, 0, 1, 1, 1], [0], [0]>} : vector<2x8x16xbf16>, vector<2x8x16xbf16>, vector<2x8x8xf32> -> vector<2x8x8xf32>
    %cst_76 = arith.constant 2.500000e-01 : f32
    %249 = vector.broadcast %cst_76 : f32 to vector<2x8x8xf32>
    %250 = arith.mulf %248, %249 : vector<2x8x8xf32>
    %251 = vector.shape_cast %48 : vector<2x8xf32> to vector<2x1x8xf32>
    %252 = vector.broadcast %251 : vector<2x1x8xf32> to vector<2x8x8xf32>
    %253 = arith.addf %250, %252 : vector<2x8x8xf32>
    %cst_77 = arith.constant dense<0xFF800000> : vector<2x8xf32>
    %254 = vector.multi_reduction <maximumf>, %253, %cst_77 [2] : vector<2x8x8xf32> to vector<2x8xf32>
    %255 = vector.shape_cast %254 : vector<2x8xf32> to vector<2x8x1xf32>
    %256 = vector.broadcast %255 : vector<2x8x1xf32> to vector<2x8x8xf32>
    %257 = arith.subf %253, %256 : vector<2x8x8xf32>
    %258 = math.exp %257 : vector<2x8x8xf32>
    %cst_78 = arith.constant dense<0.000000e+00> : vector<2x8xf32>
    %259 = vector.multi_reduction <add>, %258, %cst_78 [2] : vector<2x8x8xf32> to vector<2x8xf32>
    %260 = vector.shape_cast %259 : vector<2x8xf32> to vector<2x8x1xf32>
    %261 = vector.broadcast %260 : vector<2x8x1xf32> to vector<2x8x8xf32>
    %262 = arith.divf %258, %261 : vector<2x8x8xf32>
    %263 = arith.truncf %262 : vector<2x8x8xf32> to vector<2x8x8xbf16>
    %264 = arith.truncf %245 : vector<2x8x16xf32> to vector<2x8x16xbf16>
    %cst_79 = arith.constant dense<0.000000e+00> : vector<2x8x16xf32>
    %265 = tpu.matmul %263, %264, %cst_79 {dimension_numbers = #tpu.dot_dimension_numbers<[2], [1], [1], [2], [0, 0, 0, 1, 1, 2], [0], [0]>} : vector<2x8x8xbf16>, vector<2x8x16xbf16>, vector<2x8x16xf32> -> vector<2x8x16xf32>
    %c392 = arith.constant 392 : index
    %c0_80 = arith.constant 0 : index
    %266 = vector.load %arg1[%c392, %c0_80] : memref<608x128xf32, #tpu.memory_space<vmem>>, vector<16x32xf32>
    %267 = vector.shape_cast %265 : vector<2x8x16xf32> to vector<16x16xf32>
    %268 = arith.truncf %267 : vector<16x16xf32> to vector<16x16xbf16>
    %269 = arith.truncf %266 : vector<16x32xf32> to vector<16x32xbf16>
    %cst_81 = arith.constant dense<0.000000e+00> : vector<16x32xf32>
    %270 = tpu.matmul %268, %269, %cst_81 {dimension_numbers = #tpu.dot_dimension_numbers<[1], [0], [0], [1], [0, 0, 1, 1], [], []>} : vector<16x16xbf16>, vector<16x32xbf16>, vector<16x32xf32> -> vector<16x32xf32>
    %271 = arith.addf %239, %270 : vector<16x32xf32>
    %272 = vector.extract_strided_slice %221 {offsets = [0, 16], sizes = [16, 16], strides = [1, 1]} : vector<16x32xf32> to vector<16x16xf32>
    %273 = vector.shape_cast %272 : vector<16x16xf32> to vector<2x8x16xf32>
    %274 = vector.extract_strided_slice %228 {offsets = [0, 16], sizes = [16, 16], strides = [1, 1]} : vector<16x32xf32> to vector<16x16xf32>
    %275 = vector.shape_cast %274 : vector<16x16xf32> to vector<2x8x16xf32>
    %276 = vector.extract_strided_slice %235 {offsets = [0, 16], sizes = [16, 16], strides = [1, 1]} : vector<16x32xf32> to vector<16x16xf32>
    %277 = vector.shape_cast %276 : vector<16x16xf32> to vector<2x8x16xf32>
    %278 = arith.truncf %273 : vector<2x8x16xf32> to vector<2x8x16xbf16>
    %279 = arith.truncf %275 : vector<2x8x16xf32> to vector<2x8x16xbf16>
    %cst_82 = arith.constant dense<0.000000e+00> : vector<2x8x8xf32>
    %280 = tpu.matmul %278, %279, %cst_82 {dimension_numbers = #tpu.dot_dimension_numbers<[2], [2], [1], [1], [0, 0, 0, 1, 1, 1], [0], [0]>} : vector<2x8x16xbf16>, vector<2x8x16xbf16>, vector<2x8x8xf32> -> vector<2x8x8xf32>
    %cst_83 = arith.constant 2.500000e-01 : f32
    %281 = vector.broadcast %cst_83 : f32 to vector<2x8x8xf32>
    %282 = arith.mulf %280, %281 : vector<2x8x8xf32>
    %283 = vector.shape_cast %48 : vector<2x8xf32> to vector<2x1x8xf32>
    %284 = vector.broadcast %283 : vector<2x1x8xf32> to vector<2x8x8xf32>
    %285 = arith.addf %282, %284 : vector<2x8x8xf32>
    %cst_84 = arith.constant dense<0xFF800000> : vector<2x8xf32>
    %286 = vector.multi_reduction <maximumf>, %285, %cst_84 [2] : vector<2x8x8xf32> to vector<2x8xf32>
    %287 = vector.shape_cast %286 : vector<2x8xf32> to vector<2x8x1xf32>
    %288 = vector.broadcast %287 : vector<2x8x1xf32> to vector<2x8x8xf32>
    %289 = arith.subf %285, %288 : vector<2x8x8xf32>
    %290 = math.exp %289 : vector<2x8x8xf32>
    %cst_85 = arith.constant dense<0.000000e+00> : vector<2x8xf32>
    %291 = vector.multi_reduction <add>, %290, %cst_85 [2] : vector<2x8x8xf32> to vector<2x8xf32>
    %292 = vector.shape_cast %291 : vector<2x8xf32> to vector<2x8x1xf32>
    %293 = vector.broadcast %292 : vector<2x8x1xf32> to vector<2x8x8xf32>
    %294 = arith.divf %290, %293 : vector<2x8x8xf32>
    %295 = arith.truncf %294 : vector<2x8x8xf32> to vector<2x8x8xbf16>
    %296 = arith.truncf %277 : vector<2x8x16xf32> to vector<2x8x16xbf16>
    %cst_86 = arith.constant dense<0.000000e+00> : vector<2x8x16xf32>
    %297 = tpu.matmul %295, %296, %cst_86 {dimension_numbers = #tpu.dot_dimension_numbers<[2], [1], [1], [2], [0, 0, 0, 1, 1, 2], [0], [0]>} : vector<2x8x8xbf16>, vector<2x8x16xbf16>, vector<2x8x16xf32> -> vector<2x8x16xf32>
    %c408 = arith.constant 408 : index
    %c0_87 = arith.constant 0 : index
    %298 = vector.load %arg1[%c408, %c0_87] : memref<608x128xf32, #tpu.memory_space<vmem>>, vector<16x32xf32>
    %299 = vector.shape_cast %297 : vector<2x8x16xf32> to vector<16x16xf32>
    %300 = arith.truncf %299 : vector<16x16xf32> to vector<16x16xbf16>
    %301 = arith.truncf %298 : vector<16x32xf32> to vector<16x32xbf16>
    %cst_88 = arith.constant dense<0.000000e+00> : vector<16x32xf32>
    %302 = tpu.matmul %300, %301, %cst_88 {dimension_numbers = #tpu.dot_dimension_numbers<[1], [0], [0], [1], [0, 0, 1, 1], [], []>} : vector<16x16xbf16>, vector<16x32xbf16>, vector<16x32xf32> -> vector<16x32xf32>
    %303 = arith.addf %271, %302 : vector<16x32xf32>
    %304 = arith.addf %214, %303 : vector<16x32xf32>
    %c524 = arith.constant 524 : index
    %c0_89 = arith.constant 0 : index
    %305 = vector.load %arg1[%c524, %c0_89] : memref<608x128xf32, #tpu.memory_space<vmem>>, vector<1x32xf32>
    %c525 = arith.constant 525 : index
    %c0_90 = arith.constant 0 : index
    %306 = vector.load %arg1[%c525, %c0_90] : memref<608x128xf32, #tpu.memory_space<vmem>>, vector<1x32xf32>
    %cst_91 = arith.constant dense<0.000000e+00> : vector<16xf32>
    %307 = vector.multi_reduction <add>, %304, %cst_91 [1] : vector<16x32xf32> to vector<16xf32>
    %308 = vector.shape_cast %307 : vector<16xf32> to vector<16x1xf32>
    %cst_92 = arith.constant 3.200000e+01 : f32
    %309 = vector.broadcast %cst_92 : f32 to vector<16x1xf32>
    %310 = arith.divf %308, %309 : vector<16x1xf32>
    %311 = vector.broadcast %310 : vector<16x1xf32> to vector<16x32xf32>
    %312 = arith.subf %304, %311 : vector<16x32xf32>
    %313 = arith.mulf %312, %312 : vector<16x32xf32>
    %cst_93 = arith.constant dense<0.000000e+00> : vector<16xf32>
    %314 = vector.multi_reduction <add>, %313, %cst_93 [1] : vector<16x32xf32> to vector<16xf32>
    %315 = vector.shape_cast %314 : vector<16xf32> to vector<16x1xf32>
    %cst_94 = arith.constant 3.200000e+01 : f32
    %316 = vector.broadcast %cst_94 : f32 to vector<16x1xf32>
    %317 = arith.divf %315, %316 : vector<16x1xf32>
    %318 = vector.broadcast %310 : vector<16x1xf32> to vector<16x32xf32>
    %319 = arith.subf %304, %318 : vector<16x32xf32>
    %cst_95 = arith.constant 9.99999996E-13 : f32
    %320 = vector.broadcast %cst_95 : f32 to vector<16x1xf32>
    %321 = arith.addf %317, %320 : vector<16x1xf32>
    %322 = math.rsqrt %321 : vector<16x1xf32>
    %323 = vector.broadcast %322 : vector<16x1xf32> to vector<16x32xf32>
    %324 = arith.mulf %319, %323 : vector<16x32xf32>
    %325 = vector.broadcast %305 : vector<1x32xf32> to vector<16x32xf32>
    %326 = arith.mulf %324, %325 : vector<16x32xf32>
    %327 = vector.broadcast %306 : vector<1x32xf32> to vector<16x32xf32>
    %328 = arith.addf %326, %327 : vector<16x32xf32>
    %c424 = arith.constant 424 : index
    %c0_96 = arith.constant 0 : index
    %329 = vector.load %arg1[%c424, %c0_96] : memref<608x128xf32, #tpu.memory_space<vmem>>, vector<32x64xf32>
    %330 = arith.truncf %328 : vector<16x32xf32> to vector<16x32xbf16>
    %331 = arith.truncf %329 : vector<32x64xf32> to vector<32x64xbf16>
    %cst_97 = arith.constant dense<0.000000e+00> : vector<16x64xf32>
    %332 = tpu.matmul %330, %331, %cst_97 {dimension_numbers = #tpu.dot_dimension_numbers<[1], [0], [0], [1], [0, 0, 1, 1], [], []>} : vector<16x32xbf16>, vector<32x64xbf16>, vector<16x64xf32> -> vector<16x64xf32>
    %c526 = arith.constant 526 : index
    %c0_98 = arith.constant 0 : index
    %333 = vector.load %arg1[%c526, %c0_98] : memref<608x128xf32, #tpu.memory_space<vmem>>, vector<1x64xf32>
    %334 = vector.broadcast %333 : vector<1x64xf32> to vector<16x64xf32>
    %335 = arith.addf %332, %334 : vector<16x64xf32>
    %336 = arith.mulf %335, %335 : vector<16x64xf32>
    %337 = arith.mulf %335, %336 : vector<16x64xf32>
    %cst_99 = arith.constant 4.471500e-02 : f32
    %338 = vector.broadcast %cst_99 : f32 to vector<16x64xf32>
    %339 = arith.mulf %338, %337 : vector<16x64xf32>
    %340 = arith.addf %335, %339 : vector<16x64xf32>
    %cst_100 = arith.constant 0.797884583 : f32
    %341 = vector.broadcast %cst_100 : f32 to vector<16x64xf32>
    %342 = arith.mulf %341, %340 : vector<16x64xf32>
    %343 = math.tanh %342 : vector<16x64xf32>
    %cst_101 = arith.constant 1.000000e+00 : f32
    %344 = vector.broadcast %cst_101 : f32 to vector<16x64xf32>
    %345 = arith.addf %344, %343 : vector<16x64xf32>
    %cst_102 = arith.constant 5.000000e-01 : f32
    %346 = vector.broadcast %cst_102 : f32 to vector<16x64xf32>
    %347 = arith.mulf %346, %345 : vector<16x64xf32>
    %348 = arith.mulf %335, %347 : vector<16x64xf32>
    %c456 = arith.constant 456 : index
    %c0_103 = arith.constant 0 : index
    %349 = vector.load %arg1[%c456, %c0_103] : memref<608x128xf32, #tpu.memory_space<vmem>>, vector<64x32xf32>
    %350 = arith.truncf %348 : vector<16x64xf32> to vector<16x64xbf16>
    %351 = arith.truncf %349 : vector<64x32xf32> to vector<64x32xbf16>
    %cst_104 = arith.constant dense<0.000000e+00> : vector<16x32xf32>
    %352 = tpu.matmul %350, %351, %cst_104 {dimension_numbers = #tpu.dot_dimension_numbers<[1], [0], [0], [1], [0, 0, 1, 1], [], []>} : vector<16x64xbf16>, vector<64x32xbf16>, vector<16x32xf32> -> vector<16x32xf32>
    %c527 = arith.constant 527 : index
    %c0_105 = arith.constant 0 : index
    %353 = vector.load %arg1[%c527, %c0_105] : memref<608x128xf32, #tpu.memory_space<vmem>>, vector<1x32xf32>
    %354 = vector.broadcast %353 : vector<1x32xf32> to vector<16x32xf32>
    %355 = arith.addf %352, %354 : vector<16x32xf32>
    %356 = arith.addf %328, %355 : vector<16x32xf32>
    %c528 = arith.constant 528 : index
    %c0_106 = arith.constant 0 : index
    %357 = vector.load %arg1[%c528, %c0_106] : memref<608x128xf32, #tpu.memory_space<vmem>>, vector<1x32xf32>
    %c529 = arith.constant 529 : index
    %c0_107 = arith.constant 0 : index
    %358 = vector.load %arg1[%c529, %c0_107] : memref<608x128xf32, #tpu.memory_space<vmem>>, vector<1x32xf32>
    %cst_108 = arith.constant dense<0.000000e+00> : vector<16xf32>
    %359 = vector.multi_reduction <add>, %356, %cst_108 [1] : vector<16x32xf32> to vector<16xf32>
    %360 = vector.shape_cast %359 : vector<16xf32> to vector<16x1xf32>
    %cst_109 = arith.constant 3.200000e+01 : f32
    %361 = vector.broadcast %cst_109 : f32 to vector<16x1xf32>
    %362 = arith.divf %360, %361 : vector<16x1xf32>
    %363 = vector.broadcast %362 : vector<16x1xf32> to vector<16x32xf32>
    %364 = arith.subf %356, %363 : vector<16x32xf32>
    %365 = arith.mulf %364, %364 : vector<16x32xf32>
    %cst_110 = arith.constant dense<0.000000e+00> : vector<16xf32>
    %366 = vector.multi_reduction <add>, %365, %cst_110 [1] : vector<16x32xf32> to vector<16xf32>
    %367 = vector.shape_cast %366 : vector<16xf32> to vector<16x1xf32>
    %cst_111 = arith.constant 3.200000e+01 : f32
    %368 = vector.broadcast %cst_111 : f32 to vector<16x1xf32>
    %369 = arith.divf %367, %368 : vector<16x1xf32>
    %370 = vector.broadcast %362 : vector<16x1xf32> to vector<16x32xf32>
    %371 = arith.subf %356, %370 : vector<16x32xf32>
    %cst_112 = arith.constant 9.99999996E-13 : f32
    %372 = vector.broadcast %cst_112 : f32 to vector<16x1xf32>
    %373 = arith.addf %369, %372 : vector<16x1xf32>
    %374 = math.rsqrt %373 : vector<16x1xf32>
    %375 = vector.broadcast %374 : vector<16x1xf32> to vector<16x32xf32>
    %376 = arith.mulf %371, %375 : vector<16x32xf32>
    %377 = vector.broadcast %357 : vector<1x32xf32> to vector<16x32xf32>
    %378 = arith.mulf %376, %377 : vector<16x32xf32>
    %379 = vector.broadcast %358 : vector<1x32xf32> to vector<16x32xf32>
    %380 = arith.addf %378, %379 : vector<16x32xf32>
    %381 = vector.shape_cast %380 : vector<16x32xf32> to vector<2x8x32xf32>
    %382 = vector.extract_strided_slice %381 {offsets = [0, 0, 0], sizes = [2, 1, 32], strides = [1, 1, 1]} : vector<2x8x32xf32> to vector<2x1x32xf32>
    %383 = vector.shape_cast %382 : vector<2x1x32xf32> to vector<2x32xf32>
    %c536 = arith.constant 536 : index
    %c0_113 = arith.constant 0 : index
    %384 = vector.load %arg1[%c536, %c0_113] : memref<608x128xf32, #tpu.memory_space<vmem>>, vector<32x32xf32>
    %385 = arith.truncf %383 : vector<2x32xf32> to vector<2x32xbf16>
    %386 = arith.truncf %384 : vector<32x32xf32> to vector<32x32xbf16>
    %cst_114 = arith.constant dense<0.000000e+00> : vector<2x32xf32>
    %387 = tpu.matmul %385, %386, %cst_114 {dimension_numbers = #tpu.dot_dimension_numbers<[1], [0], [0], [1], [0, 0, 1, 1], [], []>} : vector<2x32xbf16>, vector<32x32xbf16>, vector<2x32xf32> -> vector<2x32xf32>
    %c568 = arith.constant 568 : index
    %c0_115 = arith.constant 0 : index
    %388 = vector.load %arg1[%c568, %c0_115] : memref<608x128xf32, #tpu.memory_space<vmem>>, vector<1x32xf32>
    %389 = vector.broadcast %388 : vector<1x32xf32> to vector<2x32xf32>
    %390 = arith.addf %387, %389 : vector<2x32xf32>
    %391 = math.tanh %390 : vector<2x32xf32>
    %c576 = arith.constant 576 : index
    %c0_116 = arith.constant 0 : index
    %392 = vector.load %arg1[%c576, %c0_116] : memref<608x128xf32, #tpu.memory_space<vmem>>, vector<32x128xf32>
    %393 = arith.truncf %391 : vector<2x32xf32> to vector<2x32xbf16>
    %394 = arith.truncf %392 : vector<32x128xf32> to vector<32x128xbf16>
    %cst_117 = arith.constant dense<0.000000e+00> : vector<2x128xf32>
    %395 = tpu.matmul %393, %394, %cst_117 {dimension_numbers = #tpu.dot_dimension_numbers<[1], [0], [0], [1], [0, 0, 1, 1], [], []>} : vector<2x32xbf16>, vector<32x128xbf16>, vector<2x128xf32> -> vector<2x128xf32>
    %c569 = arith.constant 569 : index
    %c0_118 = arith.constant 0 : index
    %396 = vector.load %arg1[%c569, %c0_118] : memref<608x128xf32, #tpu.memory_space<vmem>>, vector<1x128xf32>
    %397 = vector.broadcast %396 : vector<1x128xf32> to vector<2x128xf32>
    %398 = arith.addf %395, %397 : vector<2x128xf32>
    %c0_119 = arith.constant 0 : index
    %c16 = arith.constant 16 : index
    %399 = vector.load %arg0[%c0_119, %c16] : memref<16x128xi32, #tpu.memory_space<vmem>>, vector<2x1xi32>
    %c0_120 = arith.constant 0 : index
    %c17 = arith.constant 17 : index
    %400 = vector.load %arg0[%c0_120, %c17] : memref<16x128xi32, #tpu.memory_space<vmem>>, vector<2x1xi32>
    %401 = vector.extract_strided_slice %398 {offsets = [0, 0], sizes = [2, 4], strides = [1, 1]} : vector<2x128xf32> to vector<2x4xf32>
    %cst_121 = arith.constant dense<0xFF800000> : vector<2xf32>
    %402 = vector.multi_reduction <maximumf>, %401, %cst_121 [1] : vector<2x4xf32> to vector<2xf32>
    %403 = vector.shape_cast %402 : vector<2xf32> to vector<2x1xf32>
    %404 = vector.broadcast %403 : vector<2x1xf32> to vector<2x4xf32>
    %405 = arith.subf %401, %404 : vector<2x4xf32>
    %406 = math.exp %405 : vector<2x4xf32>
    %cst_122 = arith.constant dense<0.000000e+00> : vector<2xf32>
    %407 = vector.multi_reduction <add>, %406, %cst_122 [1] : vector<2x4xf32> to vector<2xf32>
    %408 = vector.shape_cast %407 : vector<2xf32> to vector<2x1xf32>
    %409 = math.log %408 : vector<2x1xf32>
    %410 = arith.addf %409, %403 : vector<2x1xf32>
    %411 = vector.broadcast %410 : vector<2x1xf32> to vector<2x4xf32>
    %412 = arith.subf %401, %411 : vector<2x4xf32>
    %413 = tpu.iota {dimensions = array<i32: 1>} : vector<2x4xi32>
    %414 = vector.broadcast %399 : vector<2x1xi32> to vector<2x4xi32>
    %415 = arith.cmpi eq, %414, %413 : vector<2x4xi32>
    %416 = arith.extui %415 : vector<2x4xi1> to vector<2x4xi32>
    %417 = arith.sitofp %416 : vector<2x4xi32> to vector<2x4xf32>
    %418 = arith.mulf %417, %412 : vector<2x4xf32>
    %cst_123 = arith.constant dense<0.000000e+00> : vector<2xf32>
    %419 = vector.multi_reduction <add>, %418, %cst_123 [1] : vector<2x4xf32> to vector<2xf32>
    %420 = vector.shape_cast %419 : vector<2xf32> to vector<2x1xf32>
    %cst_124 = arith.constant 0.000000e+00 : f32
    %421 = vector.broadcast %cst_124 : f32 to vector<2x1xf32>
    %422 = arith.subf %421, %420 : vector<2x1xf32>
    %cst_125 = arith.constant dense<0.000000e+00> : vector<1xf32>
    %423 = vector.multi_reduction <add>, %422, %cst_125 [0] : vector<2x1xf32> to vector<1xf32>
    %424 = vector.shape_cast %423 : vector<1xf32> to vector<1x1xf32>
    %cst_126 = arith.constant 5.000000e-01 : f32
    %425 = vector.broadcast %cst_126 : f32 to vector<1x1xf32>
    %426 = arith.mulf %424, %425 : vector<1x1xf32>
    %427 = vector.extract_strided_slice %398 {offsets = [0, 4], sizes = [2, 3], strides = [1, 1]} : vector<2x128xf32> to vector<2x3xf32>
    %cst_127 = arith.constant dense<0xFF800000> : vector<2xf32>
    %428 = vector.multi_reduction <maximumf>, %427, %cst_127 [1] : vector<2x3xf32> to vector<2xf32>
    %429 = vector.shape_cast %428 : vector<2xf32> to vector<2x1xf32>
    %430 = vector.broadcast %429 : vector<2x1xf32> to vector<2x3xf32>
    %431 = arith.subf %427, %430 : vector<2x3xf32>
    %432 = math.exp %431 : vector<2x3xf32>
    %cst_128 = arith.constant dense<0.000000e+00> : vector<2xf32>
    %433 = vector.multi_reduction <add>, %432, %cst_128 [1] : vector<2x3xf32> to vector<2xf32>
    %434 = vector.shape_cast %433 : vector<2xf32> to vector<2x1xf32>
    %435 = math.log %434 : vector<2x1xf32>
    %436 = arith.addf %435, %429 : vector<2x1xf32>
    %437 = vector.broadcast %436 : vector<2x1xf32> to vector<2x3xf32>
    %438 = arith.subf %427, %437 : vector<2x3xf32>
    %439 = tpu.iota {dimensions = array<i32: 1>} : vector<2x3xi32>
    %440 = vector.broadcast %400 : vector<2x1xi32> to vector<2x3xi32>
    %441 = arith.cmpi eq, %440, %439 : vector<2x3xi32>
    %442 = arith.extui %441 : vector<2x3xi1> to vector<2x3xi32>
    %443 = arith.sitofp %442 : vector<2x3xi32> to vector<2x3xf32>
    %444 = arith.mulf %443, %438 : vector<2x3xf32>
    %cst_129 = arith.constant dense<0.000000e+00> : vector<2xf32>
    %445 = vector.multi_reduction <add>, %444, %cst_129 [1] : vector<2x3xf32> to vector<2xf32>
    %446 = vector.shape_cast %445 : vector<2xf32> to vector<2x1xf32>
    %cst_130 = arith.constant 0.000000e+00 : f32
    %447 = vector.broadcast %cst_130 : f32 to vector<2x1xf32>
    %448 = arith.subf %447, %446 : vector<2x1xf32>
    %cst_131 = arith.constant dense<0.000000e+00> : vector<1xf32>
    %449 = vector.multi_reduction <add>, %448, %cst_131 [0] : vector<2x1xf32> to vector<1xf32>
    %450 = vector.shape_cast %449 : vector<1xf32> to vector<1x1xf32>
    %cst_132 = arith.constant 5.000000e-01 : f32
    %451 = vector.broadcast %cst_132 : f32 to vector<1x1xf32>
    %452 = arith.mulf %450, %451 : vector<1x1xf32>
    %453 = arith.addf %426, %452 : vector<1x1xf32>
    %454 = vector.shape_cast %453 : vector<1x1xf32> to vector<1x1xf32>
    %455 = vector.broadcast %454 : vector<1x1xf32> to vector<6x128xf32>
    %456 = tpu.concatenate %398, %455 in 0 : vector<2x128xf32>, vector<6x128xf32> -> vector<8x128xf32>
    %c0_133 = arith.constant 0 : index
    %c0_134 = arith.constant 0 : index
    %457 = vector.load %arg2[%c0_133, %c0_134] : memref<8x128xf32, #tpu.memory_space<vmem>>, vector<8x128xf32>
    tpu.vector_store %arg2[%c0_133, %c0_134], %456 {strides = array<i32>} : memref<8x128xf32, #tpu.memory_space<vmem>>, vector<8x128xf32>,
    return
  }
}

</mosaic_0001>

<bundles_post_ra>
// kernel: tpu_custom_call.1
= control target key start
LH: loop header
LB: loop body
LE: loop exit
PB: predicated region body
PF: predicated region fallthrough
CT: control target
= control target key end

     0   :  { %7 = vsyncpa [#allocation3], 0  ;;  %s3158_s0 = inlined_call_operand.hbm [shape: s32[16,128], index: 0, kind: input, shape index: {}]   ;;  %s3159_s1 = inlined_call_operand.hbm [shape: f32[608,128], index: 1, kind: input, shape index: {}]   ;;  %s3160_s2 = inlined_call_operand.hbm [shape: f32[8,128], index: 2, kind: output, shape index: {}]  }
   0x1   :  { %8 = vsyncpa [#allocation6], 0 }
   0x2   :  { %9 = vsyncpa [#allocation4], 0  ;;  %s2820_s9 = smov [#allocation2]  }
   0x3   :  { %s15_s10 = sshll.u32 %s2820_s9, 4  ;;  %s16_s10 = int_to_ptr.vmem [resolvable:$true] %s15_s10 }
   0x4   :  { %s2762_s11 = scalar_lea.vmem %s16_s10, 256  ;;  %p2767_p1 = scmp.lt.s32.totalorder %s16_s10, %s16_s10 }
   0x5   :  { %p2763_p0 = scmp.ne.s32.totalorder %s16_s10, %s2762_s11  ;;  %p2768_p2 = scmp.lt.s32.totalorder %s2762_s11, %s2762_s11 }
   0x7   :  { %p2769_p3 = por %p2768_p2, %p2767_p1 }
   0x9   :  { %p2770_p4 = pnand %p2769_p3, %p2763_p0 }
   0xb   :  { %2773 = shalt.err (!%p2770_p4)
}
   0xc   :  { %s2821_s12 = smov 128   ;;  %s2822_s13 = smov 8  }
   0xd   :  { %21 = dma.hbm_to_vmem [thread:$0]  %s3158_s0, 256, %s16_s10, [#allocation3], %s2821_s12, %s2821_s12, %s2822_s13  }
   0xe   :  { %s2823_s16 = smov [#allocation5]  }
   0xf   :  { %s27_s17 = sshll.u32 %s2823_s16, 4  ;;  %s28_s17 = int_to_ptr.vmem [resolvable:$true] %s27_s17 }
  0x10   :  { %s2782_s18 = scalar_lea.vmem %s28_s17, 9728  ;;  %p2787_p6 = scmp.lt.s32.totalorder %s28_s17, %s28_s17 }
  0x11   :  { %p2783_p5 = scmp.ne.s32.totalorder %s28_s17, %s2782_s18  ;;  %p2788_p7 = scmp.lt.s32.totalorder %s2782_s18, %s2782_s18 }
  0x13   :  { %p2789_p8 = por %p2788_p7, %p2787_p6 }
  0x15   :  { %p2790_p9 = pnand %p2789_p8, %p2783_p5 }
  0x17   :  { %2793 = shalt.err (!%p2790_p9)
}
  0x18   :  { %33 = dma.hbm_to_vmem [thread:$0]  %s3159_s1, 9728, %s28_s17, [#allocation6], %s2821_s12, %s2821_s12, %s2822_s13  }
  0x19   :  { %2814 = dma.done.wait [#allocation3], 256  }
  0x1a   :  { %2815 = vsyncadd [#allocation3], 4294967040 }
  0x1b   :  { %2816 = dma.done.wait [#allocation6], 9728  }
  0x1c   :  { %2817 = vsyncadd [#allocation6], 4294957568  ;;  %v2824_v0 = vmov 0   ;;  %v2825_v1 = vmov 0.0   ;;  %v41_v2 = vld [vmem:[#allocation2] sm:$0xff]  ;;  %v56_v4 = vld [vmem:[#allocation5 + $0x18] sm:$0xff]  ;;  %v43_v10 = vlaneseq }
  0x1d   :  { %2680 = vset.pattern.permute.xlu0 %v2824_v0  ;;  %2434 = vmatprep.subr.bf16.mxu0 %v2825_v1  ;;  %v55_v3 = vld [vmem:[#allocation5 + $0x10] sm:$0xff]  ;;  %v53_v5 = vld [vmem:[#allocation5] sm:$0xff]  ;;  %v54_v6 = vld [vmem:[#allocation5 + $0x8] sm:$0xff]  ;;  %vm2826_vm0 = vmmov 0   ;;  %vm64_vm3 = vcmask 261120   ;;  %s2828_s0 = smov 120  }
  0x1e   :  { %2442 = vmatprep.subr.bf16.mxu1 %v2825_v1  ;;  %46 = vperm.xlu0 %2680, %v41_v2   ;;  %v42_v7 = vld [vmem:[#allocation2 + $0x8] sm:$0xff]  ;;  %v63_v8 = vpack.c.bf16 %v56_v4, %v55_v3  ;;  %v62_v9 = vpack.c.bf16 %v54_v6, %v53_v5  ;;  %v2864_v11 = vand.u32 127, %v43_v10  ;;  %v109_v17 = vld [vmem:[#allocation5 + $0x20] sm:$0xff]  ;;  %v2292_v19 = vld [vmem:[#allocation5 + $0x30] ss:$0 sm:$0xff]  ;;  %vm334_vm4 = vcmask 130048  }
  0x1f   :  { %2438 = vmatprep.mubr.msk.bf16.mxu0 %vm2826_vm0, %v2825_v1  ;;  %2446 = vmatprep.mubr.msk.bf16.mxu1 %vm2826_vm0, %v2825_v1  ;;  %v166_v39 = vld [vmem:[#allocation5 + $0x48] sm:$0xff]  ;;  %v167_v40 = vld [vmem:[#allocation5 + $0x50] sm:$0xff]  ;;  %v164_v44 = vld [vmem:[#allocation5 + $0x38] sm:$0xff]  ;;  %vm498_vm5 = vcmask 1043456   ;;  %vm468_vm6 = vcmask 64512   ;;  %s2829_s1 = smov 112  }
  0x20   :  { %2435 = vmatpush3.bf16.msra.mxu0 %v63_v8  ;;  %v222_v41 = vld [vmem:[#allocation5 + $0x68] sm:$0xff]  ;;  %v170_v42 = vpack.c.bf16 %v167_v40, %v166_v39  ;;  %v223_v43 = vld [vmem:[#allocation5 + $0x70] sm:$0xff]  ;;  %v165_v45 = vld [vmem:[#allocation5 + $0x40] sm:$0xff]  ;;  %vm1052_vm7 = vcmask 523264   ;;  %vm2091_vm8 = vcmask 1041409   ;;  %vm2228_vm9 = vcmask 50208  }
  0x21   :  { %2436 = vmatprep.subr.bf16.mxu0 %v2825_v1  ;;  %v225_v46 = vpack.c.bf16 %v223_v43, %v222_v41  ;;  %v220_v47 = vld [vmem:[#allocation5 + $0x58] sm:$0xff]  ;;  %v221_v48 = vld [vmem:[#allocation5 + $0x60] sm:$0xff]  ;;  %v169_v49 = vpack.c.bf16 %v165_v45, %v164_v44  ;;  %v2293_v59 = vld [vmem:[#allocation5 + $0x31] ss:$0 sm:$0xff]  ;;  %vm2194_vm10 = vcmask 25600   ;;  %s2831_s21 = smov 124  }
  0x22   :  { %49 = vperm.xlu0 %2680, %v42_v7   ;;  %2443 = vmatpush3.bf16.msra.mxu1 %v170_v42  ;;  %v224_v50 = vpack.c.bf16 %v221_v48, %v220_v47  ;;  %v2294_v63 = vld [vmem:[#allocation5 + $0x32] ss:$0 sm:$0xff]  ;;  %v274_v2 = vld [vmem:[#allocation5 + $0x88] sm:$0xff]  ;;  %v272_v8 = vld [vmem:[#allocation5 + $0x78] sm:$0xff]  ;;  %vm2239_vm11 = vcmask 17408   ;;  %vm2219_vm14 = vcmask 1041408  }
  0x23   :  { %2444 = vmatprep.subr.bf16.mxu1 %v2825_v1  ;;  %v275_v3 = vld [vmem:[#allocation5 + $0x90] sm:$0xff]  ;;  %v2299_v42 = vld [vmem:[#allocation5 + $0x11a] ss:$0 sm:$0xff]  ;;  %s2833_s22 = smov [#allocation7]  }
  0x24   :  { %2437 = vmatpush3.bf16.msra.mxu0 %v62_v9  ;;  %v277_v6 = vpack.c.bf16 %v275_v3, %v274_v2  ;;  %v273_v9 = vld [vmem:[#allocation5 + $0x80] sm:$0xff]  ;;  %s2279_s23 = sshll.u32 %s2833_s22, 4  ;;  %s2280_s23 = int_to_ptr.vmem [resolvable:$true] %s2279_s23 }
  0x25   :  { %2450 = vmatprep.subr.bf16.mxu0 %v2825_v1  ;;  %s2794_s24 = scalar_lea.vmem %s2280_s23, 128  ;;  %p2799_p11 = scmp.lt.s32.totalorder %s2280_s23, %s2280_s23 }
  0x26   :  { %2445 = vmatpush3.bf16.msra.mxu1 %v169_v49  ;;  %p2795_p10 = scmp.ne.s32.totalorder %s2280_s23, %s2794_s24  ;;  %p2800_p12 = scmp.lt.s32.totalorder %s2794_s24, %s2794_s24 }
  0x27   :  { %2458 = vmatprep.subr.bf16.mxu1 %v2825_v1 }
  0x28   :  { %p2801_p13 = por %p2800_p12, %p2799_p11 }
  0x2a   :  { %p2802_p0 = pnand %p2801_p13, %p2795_p10 }
  0x99   :  { %v47_v12 = vpop.permute.xlu0 %46 }
  0x9a   :  { %vm51_vm1 = vcmp.eq.s32.totalorder %v47_v12, %v2864_v11  ;;  %v276_v12 = vpack.c.bf16 %v273_v9, %v272_v8 }
  0x9b   :  { %v2289_v14 = vsel %vm51_vm1, 1.0, %v2825_v1 }
  0x9d   :  { %v50_v13 = vpop.permute.xlu0 %49 }
  0x9e   :  { %vm52_vm2 = vcmp.eq.s32.totalorder %v50_v13, %v2864_v11  ;;  %v160_v13 = vld [vmem:[#allocation2] sm:$0x3] }
  0x9f   :  { %v2290_v15 = vsel %vm52_vm2, 1.0, %v2825_v1 }
  0xa0   :  { %v61_v16 = vpack.c.bf16 %v2290_v15, %v2289_v14  ;;  %v161_v14 = vcvt.s32.f32 %v160_v13  ;;  %v2827_v15 = vmov 1966171168  }
  0xa2   :  { %2439 = vmatmul.mubr.msk.bf16.vlgmr.msra.gmra.mxu0 %vm64_vm3, %v61_v16  ;;  %v431_v16 = vunpack.c.l.s4 %v2827_v15 }
  0xa3   :  { %2454 = vmatprep.mubr.msk.bf16.mxu0 %vm2826_vm0, %v2825_v1  ;;  %2451 = vmatpush3.bf16.msra.mxu0 %v225_v46 }
  0xa4   :  { %2452 = vmatprep.subr.bf16.mxu0 %v2825_v1 }
  0xa7   :  { %2453 = vmatpush3.bf16.msra.mxu0 %v224_v50 }
  0xa8   :  { %2466 = vmatprep.subr.bf16.mxu0 %v2825_v1 }
 0x162   :  { %v102_v18 = vpop.f32.mrf.mxu0 }
 0x163   :  { %v110_v20 = vadd.f32 %v109_v17, %v102_v18  ;;  %v162_v18 = vsub.f32 1.0, %v161_v14 }
 0x164   :  { %v2440_v21 = vpop.f32.mrf.mxu0 }
 0x165   :  { %v117_v22 = vadd.f32 %v2292_v19, %v110_v20  ;;  %v163_v20 = vmul.f32 -1e+09, %v162_v18 }
 0x166   :  { %v105_v23 = vpop.f32.mrf.mxu0 }
 0x167   :  { %v111_v24 = vadd.f32 %v109_v17, %v105_v23  ;;  %v121_v25 = vsel %vm64_vm3, %v117_v22, 0.0  ;;  %v434_v17 = vshrl.u32 %v43_v10, 7 }
 0x168   :  { %122 = vadd.xlane.f32.xlu1 %v121_v25  ;;  %v2441_v26 = vpop.f32.mrf.mxu0 }
 0x169   :  { %v118_v27 = vadd.f32 %v2292_v19, %v111_v24  ;;  %v432_v19 = vunpack.c.0.s8 %v431_v16  ;;  %v454_v23 = vsub.s32 0, %v434_v17 }
 0x16b   :  { %v124_v28 = vsel %vm64_vm3, %v118_v27, 0.0  ;;  %v435_v21 = vsub.s32 %v432_v19, %v434_v17 }
 0x16c   :  { %125 = vadd.xlane.f32.xlu1 %v124_v28 }
 0x1f1   :  { %v123_v29 = vpop.xlane.xlu1 %122 }
 0x1f2   :  { %v128_v30 = vmul.f32 0.03125, %v123_v29  ;;  %v2297_v29 = vld [vmem:[#allocation5 + $0x119] ss:$0 sm:$0xff] }
 0x1f4   :  { %v130_v31 = vsub.f32 %v117_v22, %v128_v30  ;;  %v436_v22 = vrot.slane %v163_v20, %v435_v21 }
 0x1f5   :  { %v126_v32 = vpop.xlane.xlu1 %125 }
 0x1f6   :  { %v129_v33 = vmul.f32 0.03125, %v126_v32  ;;  %v132_v34 = vmul.f32 %v130_v31, %v130_v31  ;;  %v444_v24 = vrot.slane %v436_v22, %v435_v21  ;;  %v437_v25 = vcombine.high %v436_v22, %v436_v22 }
 0x1f8   :  { %v131_v35 = vsub.f32 %v118_v27, %v129_v33  ;;  %v134_v36 = vsel %vm64_vm3, %v132_v34, 0.0  ;;  %v455_v26 = vrot.slane %v444_v24, %v454_v23  ;;  %v451_v27 = vrot.slane %v437_v25, %v435_v21 }
 0x1f9   :  { %135 = vadd.xlane.f32.xlu0 %v134_v36 }
 0x1fa   :  { %v133_v37 = vmul.f32 %v131_v35, %v131_v35  ;;  %v459_v28 = vrot.slane %v451_v27, %v454_v23 }
 0x1fc   :  { %v137_v38 = vsel %vm64_vm3, %v133_v37, 0.0 }
 0x1fd   :  { %138 = vadd.xlane.f32.xlu1 %v137_v38 }
 0x20e   :  { %460 = vrot.lane.b32.xlu1 %v455_v26, %s2828_s0 }
 0x212   :  { %462 = vrot.lane.b32.xlu1 %v459_v28, %s2828_s0 }
 0x282   :  { %v136_v51 = vpop.xlane.xlu0 %135 }
 0x283   :  { %v140_v52 = vmul.f32 0.03125, %v136_v51 }
 0x285   :  { %v142_v53 = vadd.f32 1e-12, %v140_v52 }
 0x286   :  { %v139_v54 = vpop.xlane.xlu1 %138 }
 0x287   :  { %2684 = vrsqrt.f32 %v142_v53  ;;  %v141_v55 = vmul.f32 0.03125, %v139_v54 }
 0x289   :  { %v143_v56 = vadd.f32 1e-12, %v141_v55 }
 0x28b   :  { %2686 = vrsqrt.f32 %v143_v56 }
 0x294   :  { %v2685_v57 = vpop.eup %2684 }
 0x295   :  { %v146_v58 = vmul.f32 %v2685_v57, %v130_v31 }
 0x297   :  { %v152_v62 = vmul.f32 %v2293_v59, %v146_v58 }
 0x298   :  { %v2687_v60 = vpop.eup %2686 }
 0x299   :  { %v147_v61 = vmul.f32 %v2687_v60, %v131_v35  ;;  %v2881_v4 = vadd.f32 %v2294_v63, %v152_v62  ;;  %v2295_v35 = vld [vmem:[#allocation5 + $0x118] ss:$0 sm:$0xff] }
 0x29b   :  { %v153_v0 = vmul.f32 %v2293_v59, %v147_v61  ;;  %v2922_v59 = vpop.permute.xlu1 %460 }
 0x29d   :  { %v2883_v5 = vadd.f32 %v2294_v63, %v153_v0 }
 0x29f   :  { %v168_v7 = vpack.c.bf16 %v2883_v5, %v2881_v4  ;;  %v2924_v63 = vpop.permute.xlu1 %462 }
 0x2a1   :  { %2447 = vmatmul.mubr.msk.bf16.vlgmr.msra.gmra.mxu1 %vm64_vm3, %v168_v7  ;;  %2455 = vmatmul.mubr.msk.bf16.vlgmr.msra.gmra.mxu0 %vm64_vm3, %v168_v7 }
 0x2a2   :  { %2459 = vmatpush3.bf16.msra.mxu1 %v277_v6  ;;  %2462 = vmatprep.mubr.msk.bf16.mxu1 %vm2826_vm0, %v2825_v1 }
 0x2a3   :  { %2460 = vmatprep.subr.bf16.mxu1 %v2825_v1  ;;  %2468 = vmatprep.mubr.msk.bf16.mxu0 %vm2826_vm0, %v2825_v1 }
 0x2a6   :  { %2461 = vmatpush3.bf16.msra.mxu1 %v276_v12 }
 0x2a7   :  { %2472 = vmatprep.subr.bf16.mxu1 %v2825_v1 }
 0x2a9   :  { %2463 = vmatmul.mubr.msk.bf16.vlgmr.msra.gmra.mxu1 %vm64_vm3, %v168_v7 }
 0x2aa   :  { %2474 = vmatprep.mubr.msk.bf16.mxu1 %vm2826_vm0, %v2825_v1 }
 0x361   :  { %v213_v30 = vpop.f32.mrf.mxu1  ;;  %v265_v31 = vpop.f32.mrf.mxu0 }
 0x362   :  { %v266_v32 = vadd.f32 %v2297_v29, %v265_v31  ;;  %v214_v43 = vadd.f32 %v2295_v35, %v213_v30 }
 0x363   :  { %v2448_v10 = vpop.f32.mrf.mxu1  ;;  %v2456_v33 = vpop.f32.mrf.mxu0 }
 0x364   :  { %v2899_v34 = vpack.c.bf16 %v266_v32, %v266_v32  ;;  %v330_v49 = vpack.c.bf16 %v214_v43, %v214_v43 }
 0x365   :  { %v216_v36 = vpop.f32.mrf.mxu1  ;;  %v268_v37 = vpop.f32.mrf.mxu0 }
 0x366   :  { %v339_v38 = vsel %vm334_vm4, %v2899_v34, 0  ;;  %v269_v39 = vadd.f32 %v2297_v29, %v268_v37  ;;  %v217_v50 = vadd.f32 %v2295_v35, %v216_v36  ;;  %v588_v36 = vld [vmem:[#allocation5 + $0x98] sm:$0xff]  ;;  %v589_v37 = vld [vmem:[#allocation5 + $0xa0] sm:$0xff] }
 0x367   :  { %v2449_v40 = vpop.f32.mrf.mxu1  ;;  %v2457_v41 = vpop.f32.mrf.mxu0  ;;  %2467 = vmatpush3.bf16.xpose.msra.mxu0 %v339_v38  ;;  %v591_v38 = vpack.c.bf16 %v589_v37, %v588_v36 }
 0x368   :  { %v333_v44 = vpack.c.bf16 %v269_v39, %v269_v39  ;;  %2478 = vmatprep.subr.bf16.mxu0 %v2825_v1  ;;  %v331_v56 = vpack.c.bf16 %v217_v50, %v217_v50 }
 0x369   :  { %v317_v45 = vpop.f32.mrf.mxu1 }
 0x36a   :  { %v385_v46 = vsel %vm334_vm4, %v333_v44, 0  ;;  %v318_v47 = vadd.f32 %v2299_v42, %v317_v45 }
 0x36b   :  { %v2464_v48 = vpop.f32.mrf.mxu1  ;;  %2473 = vmatpush3.bf16.xpose.msra.mxu1 %v385_v46 }
 0x36c   :  { %v2905_v51 = vpack.c.bf16 %v318_v47, %v318_v47  ;;  %2484 = vmatprep.subr.bf16.mxu1 %v2825_v1 }
 0x36d   :  { %v320_v52 = vpop.f32.mrf.mxu1 }
 0x36e   :  { %v500_v53 = vsel %vm498_vm5, %v2905_v51, 0  ;;  %v321_v54 = vadd.f32 %v2299_v42, %v320_v52  ;;  %2469 = vmatmul.mubr.msk.bf16.vlgmr.msra.gmra.mxu0 %vm334_vm4, %v330_v49 }
 0x36f   :  { %v2465_v55 = vpop.f32.mrf.mxu1  ;;  %2479 = vmatpush3.bf16.msra.mxu0 %v500_v53  ;;  %2480 = vmatprep.mubr.msk.bf16.mxu0 %vm2826_vm0, %v2825_v1 }
 0x370   :  { %v2913_v57 = vpack.c.bf16 %v321_v54, %v321_v54  ;;  %2490 = vmatprep.subr.bf16.mxu0 %v2825_v1 }
 0x372   :  { %v546_v58 = vsel %vm498_vm5, %v2913_v57, 0  ;;  %2475 = vmatmul.mubr.msk.bf16.vlgmr.msra.gmra.mxu1 %vm334_vm4, %v331_v56 }
 0x373   :  { %2485 = vmatpush3.bf16.msra.mxu1 %v546_v58  ;;  %2486 = vmatprep.mubr.msk.bf16.mxu1 %vm2826_vm0, %v2825_v1 }
 0x374   :  { %2496 = vmatprep.subr.bf16.mxu1 %v2825_v1 }
 0x42e   :  { %v375_v60 = vpop.f32.mrf.mxu0 }
 0x42f   :  { %v427_v61 = vmul.f32 0.25, %v375_v60 }
 0x430   :  { %v2470_v62 = vpop.f32.mrf.mxu0 }
 0x431   :  { %v466_v0 = vadd.f32 %v2922_v59, %v427_v61 }
 0x432   :  { %v378_v2 = vpop.f32.mrf.mxu0  ;;  %v421_v3 = vpop.f32.mrf.mxu1 }
 0x433   :  { %v428_v6 = vmul.f32 0.25, %v421_v3  ;;  %v469_v7 = vsel %vm468_vm6, %v466_v0, -inf }
 0x434   :  { %v2476_v8 = vpop.f32.mrf.mxu1  ;;  %470 = vmax.xlane.f32.xlu1 %v469_v7  ;;  %v2471_v9 = vpop.f32.mrf.mxu0 }
 0x435   :  { %v467_v12 = vadd.f32 %v2924_v63, %v428_v6 }
 0x436   :  { %v424_v13 = vpop.f32.mrf.mxu1 }
 0x437   :  { %v472_v14 = vsel %vm468_vm6, %v467_v12, -inf }
 0x438   :  { %473 = vmax.xlane.f32.xlu0 %v472_v14  ;;  %v2477_v15 = vpop.f32.mrf.mxu1 }
 0x445   :  { %694 = vrot.lane.b32.xlu1 %v333_v44, %s2829_s1 }
 0x4bd   :  { %v471_v16 = vpop.xlane.xlu1 %470 }
 0x4be   :  { %v475_v17 = vsub.f32 %v466_v0, %v471_v16 }
 0x4c0   :  { %v477_v18 = vmul.f32 1.442695, %v475_v17 }
 0x4c1   :  { %v474_v19 = vpop.xlane.xlu0 %473  ;;  %v695_v41 = vpop.permute.xlu1 %694 }
 0x4c2   :  { %2688 = vpow2.f32 %v477_v18  ;;  %v476_v20 = vsub.f32 %v467_v12, %v474_v19  ;;  %v700_v47 = vsel %vm334_vm4, %v695_v41, 0 }
 0x4c4   :  { %v479_v21 = vmul.f32 1.442695, %v476_v20 }
 0x4c6   :  { %2690 = vpow2.f32 %v479_v21 }
 0x4cf   :  { %v2689_v22 = vpop.eup %2688 }
 0x4d0   :  { %v481_v23 = vsel %vm468_vm6, %v2689_v22, 0.0 }
 0x4d1   :  { %482 = vadd.xlane.f32.xlu0 %v481_v23 }
 0x4d3   :  { %v2691_v24 = vpop.eup %2690 }
 0x4d4   :  { %v484_v25 = vsel %vm468_vm6, %v2691_v24, 0.0 }
 0x4d5   :  { %485 = vadd.xlane.f32.xlu0 %v484_v25 }
 0x4eb   :  { %642 = vrot.lane.b32.xlu0 %v2899_v34, %s2829_s1 }
 0x4ef   :  { %639 = vrot.lane.b32.xlu0 %v330_v49, %s2829_s1 }
 0x4f3   :  { %691 = vrot.lane.b32.xlu0 %v331_v56, %s2829_s1 }
 0x55a   :  { %v483_v26 = vpop.xlane.xlu0 %482 }
 0x55b   :  { %2692 = vrcp.f32 %v483_v26 }
 0x55e   :  { %v486_v27 = vpop.xlane.xlu0 %485 }
 0x55f   :  { %2694 = vrcp.f32 %v486_v27 }
 0x562   :  { %v643_v10 = vpop.permute.xlu0 %642 }
 0x563   :  { %v648_v34 = vsel %vm334_vm4, %v643_v10, 0 }
 0x566   :  { %v640_v35 = vpop.permute.xlu0 %639 }
 0x568   :  { %v2693_v28 = vpop.eup %2692 }
 0x569   :  { %v488_v29 = vmul.f32 %v2693_v28, %v2689_v22 }
 0x56a   :  { %v692_v53 = vpop.permute.xlu0 %691 }
 0x56b   :  { %v491_v30 = vpack.c.bf16 %v488_v29, %v488_v29 }
 0x56c   :  { %v2695_v31 = vpop.eup %2694 }
 0x56d   :  { %2481 = vmatmul.mubr.msk.bf16.vlgmr.msra.gmra.mxu0 %vm468_vm6, %v491_v30  ;;  %v490_v32 = vmul.f32 %v2695_v31, %v2691_v24 }
 0x56e   :  { %2492 = vmatprep.mubr.msk.bf16.mxu0 %vm2826_vm0, %v2825_v1  ;;  %2491 = vmatpush3.bf16.msra.mxu0 %v591_v38 }
 0x56f   :  { %v492_v33 = vpack.c.bf16 %v490_v32, %v490_v32  ;;  %2502 = vmatprep.subr.bf16.mxu0 %v2825_v1 }
 0x571   :  { %2487 = vmatmul.mubr.msk.bf16.vlgmr.msra.gmra.mxu1 %vm468_vm6, %v492_v33  ;;  %v868_v33 = vld [vmem:[#allocation5 + $0xa8] sm:$0xff] }
 0x572   :  { %2497 = vmatpush3.bf16.xpose.msra.mxu1 %v648_v34  ;;  %2498 = vmatprep.mubr.msk.bf16.mxu1 %vm2826_vm0, %v2825_v1  ;;  %v869_v34 = vld [vmem:[#allocation5 + $0xb0] sm:$0xff] }
 0x573   :  { %2508 = vmatprep.subr.bf16.mxu1 %v2825_v1 }
 0x579   :  { %2499 = vmatmul.mubr.msk.bf16.vlgmr.msra.gmra.mxu1 %vm334_vm4, %v640_v35  ;;  %v871_v35 = vpack.c.bf16 %v869_v34, %v868_v33  ;;  %v1038_v34 = vld [vmem:[#allocation5 + $0xf8] sm:$0xff] }
 0x57a   :  { %2510 = vmatprep.mubr.msk.bf16.mxu1 %vm2826_vm0, %v2825_v1 }
 0x62d   :  { %v536_v39 = vpop.f32.mrf.mxu0 }
 0x62f   :  { %v2482_v40 = vpop.f32.mrf.mxu0 }
 0x631   :  { %v539_v42 = vpop.f32.mrf.mxu0  ;;  %v582_v43 = vpop.f32.mrf.mxu1 }
 0x632   :  { %v590_v44 = vpack.c.bf16 %v582_v43, %v536_v39 }
 0x633   :  { %v2483_v45 = vpop.f32.mrf.mxu0  ;;  %v2488_v46 = vpop.f32.mrf.mxu1 }
 0x634   :  { %2493 = vmatmul.mubr.msk.bf16.vlgmr.msra.gmra.mxu0 %vm334_vm4, %v590_v44  ;;  %v2301_v45 = vld [vmem:[#allocation5 + $0x11b] ss:$0 sm:$0xff] }
 0x635   :  { %2503 = vmatpush3.bf16.xpose.msra.mxu0 %v700_v47  ;;  %v585_v48 = vpop.f32.mrf.mxu1  ;;  %2504 = vmatprep.mubr.msk.bf16.mxu0 %vm2826_vm0, %v2825_v1 }
 0x636   :  { %2514 = vmatprep.subr.bf16.mxu0 %v2825_v1 }
 0x637   :  { %v2489_v49 = vpop.f32.mrf.mxu1 }
 0x639   :  { %v684_v50 = vpop.f32.mrf.mxu1 }
 0x63a   :  { %v742_v52 = vmul.f32 0.25, %v684_v50 }
 0x63b   :  { %v2500_v54 = vpop.f32.mrf.mxu1 }
 0x63c   :  { %2505 = vmatmul.mubr.msk.bf16.vlgmr.msra.gmra.mxu0 %vm334_vm4, %v692_v53  ;;  %v744_v55 = vadd.f32 %v742_v52, %v2922_v59 }
 0x63d   :  { %v687_v56 = vpop.f32.mrf.mxu1  ;;  %2516 = vmatprep.mubr.msk.bf16.mxu0 %vm2826_vm0, %v2825_v1 }
 0x63e   :  { %v746_v58 = vsel %vm468_vm6, %v744_v55, -inf }
 0x63f   :  { %747 = vmax.xlane.f32.xlu0 %v746_v58  ;;  %v2501_v60 = vpop.f32.mrf.mxu1 }
 0x6c8   :  { %v748_v61 = vpop.xlane.xlu0 %747 }
 0x6c9   :  { %v752_v62 = vsub.f32 %v744_v55, %v748_v61 }
 0x6cb   :  { %v754_v0 = vmul.f32 1.442695, %v752_v62 }
 0x6cd   :  { %2696 = vpow2.f32 %v754_v0 }
 0x6da   :  { %v2697_v2 = vpop.eup %2696 }
 0x6db   :  { %v758_v3 = vsel %vm468_vm6, %v2697_v2, 0.0 }
 0x6dc   :  { %759 = vadd.xlane.f32.xlu0 %v758_v3 }
 0x6f4   :  { %v629_v6 = vpop.f32.mrf.mxu0 }
 0x6f5   :  { %v636_v46 = vadd.f32 %v2301_v45, %v629_v6 }
 0x6f6   :  { %v2494_v7 = vpop.f32.mrf.mxu0 }
 0x6f8   :  { %v632_v8 = vpop.f32.mrf.mxu0 }
 0x6f9   :  { %v637_v50 = vadd.f32 %v2301_v45, %v632_v8 }
 0x6fa   :  { %v2495_v9 = vpop.f32.mrf.mxu0 }
 0x6fc   :  { %v736_v12 = vpop.f32.mrf.mxu0 }
 0x6fd   :  { %v743_v13 = vmul.f32 0.25, %v736_v12  ;;  %v962_v12 = vld [vmem:[#allocation5 + $0xc8] sm:$0xff] }
 0x6fe   :  { %v2506_v14 = vpop.f32.mrf.mxu0 }
 0x6ff   :  { %v745_v15 = vadd.f32 %v743_v13, %v2924_v63  ;;  %v963_v13 = vld [vmem:[#allocation5 + $0xd0] sm:$0xff]  ;;  %v960_v14 = vld [vmem:[#allocation5 + $0xb8] sm:$0xff] }
 0x700   :  { %v739_v16 = vpop.f32.mrf.mxu0 }
 0x701   :  { %v749_v17 = vsel %vm468_vm6, %v745_v15, -inf }
 0x702   :  { %750 = vmax.xlane.f32.xlu1 %v749_v17  ;;  %v2507_v18 = vpop.f32.mrf.mxu0 }
 0x713   :  { %820 = vrot.lane.b32.xlu1 %v2913_v57, %s2829_s1 }
 0x765   :  { %v760_v26 = vpop.xlane.xlu0 %759 }
 0x78b   :  { %v751_v19 = vpop.xlane.xlu1 %750 }
 0x78c   :  { %v753_v20 = vsub.f32 %v745_v15, %v751_v19  ;;  %v961_v15 = vld [vmem:[#allocation5 + $0xc0] sm:$0xff] }
 0x78d   :  { %v965_v16 = vpack.c.bf16 %v961_v15, %v960_v14 }
 0x78e   :  { %v756_v21 = vmul.f32 1.442695, %v753_v20 }
 0x78f   :  { %v821_v22 = vpop.permute.xlu1 %820 }
 0x790   :  { %2698 = vpow2.f32 %v756_v21  ;;  %v826_v23 = vsel %vm498_vm5, %v821_v22, 0 }
 0x791   :  { %2515 = vmatpush3.bf16.msra.mxu0 %v826_v23  ;;  %2700 = vrcp.f32 %v760_v26 }
 0x792   :  { %2526 = vmatprep.subr.bf16.mxu0 %v2825_v1 }
 0x79d   :  { %v2699_v24 = vpop.eup %2698 }
 0x79e   :  { %v761_v25 = vsel %vm468_vm6, %v2699_v24, 0.0  ;;  %v2701_v57 = vpop.eup %2700 }
 0x79f   :  { %762 = vadd.xlane.f32.xlu0 %v761_v25  ;;  %v765_v28 = vmul.f32 %v2701_v57, %v2697_v2  ;;  %v2312_v25 = vld [vmem:[#allocation5 + $0x11c] ss:$0 sm:$0xff] }
 0x7a1   :  { %v768_v31 = vpack.c.bf16 %v765_v28, %v765_v28  ;;  %v2313_v28 = vld [vmem:[#allocation5 + $0x11d] ss:$0 sm:$0xff] }
 0x7b5   :  { %771 = vrot.lane.b32.xlu0 %v2905_v51, %s2829_s1 }
 0x828   :  { %v763_v27 = vpop.xlane.xlu0 %762 }
 0x829   :  { %2702 = vrcp.f32 %v763_v27 }
 0x82c   :  { %v772_v29 = vpop.permute.xlu0 %771 }
 0x82d   :  { %v777_v30 = vsel %vm498_vm5, %v772_v29, 0 }
 0x82e   :  { %2509 = vmatpush3.bf16.msra.mxu1 %v777_v30 }
 0x82f   :  { %2520 = vmatprep.subr.bf16.mxu1 %v2825_v1 }
 0x831   :  { %2511 = vmatmul.mubr.msk.bf16.vlgmr.msra.gmra.mxu1 %vm468_vm6, %v768_v31 }
 0x832   :  { %2522 = vmatprep.mubr.msk.bf16.mxu1 %vm2826_vm0, %v2825_v1  ;;  %2521 = vmatpush3.bf16.msra.mxu1 %v871_v35  ;;  %v1039_v35 = vld [vmem:[#allocation5 + $0x100] sm:$0xff] }
 0x833   :  { %2534 = vmatprep.subr.bf16.mxu1 %v2825_v1 }
 0x836   :  { %v2703_v32 = vpop.eup %2702 }
 0x837   :  { %v767_v51 = vmul.f32 %v2703_v32, %v2699_v24 }
 0x839   :  { %v769_v10 = vpack.c.bf16 %v767_v51, %v767_v51  ;;  %v1040_v51 = vld [vmem:[#allocation5 + $0x108] sm:$0xff] }
 0x83b   :  { %2517 = vmatmul.mubr.msk.bf16.vlgmr.msra.gmra.mxu0 %vm468_vm6, %v769_v10  ;;  %v1041_v10 = vld [vmem:[#allocation5 + $0x110] sm:$0xff] }
 0x83c   :  { %2530 = vmatprep.mubr.msk.bf16.mxu0 %vm2826_vm0, %v2825_v1  ;;  %v1046_v33 = vpack.c.bf16 %v1041_v10, %v1040_v51  ;;  %v1141_v51 = vld [vmem:[#allocation5 + $0x138] sm:$0xff]  ;;  %v1142_v10 = vld [vmem:[#allocation5 + $0x140] sm:$0xff] }
 0x8f1   :  { %v813_v36 = vpop.f32.mrf.mxu1 }
 0x8f3   :  { %v2512_v37 = vpop.f32.mrf.mxu1 }
 0x8f4   :  { %v1036_v37 = vld [vmem:[#allocation5 + $0xe8] sm:$0xff] }
 0x8f5   :  { %v816_v38 = vpop.f32.mrf.mxu1 }
 0x8f6   :  { %v1037_v38 = vld [vmem:[#allocation5 + $0xf0] sm:$0xff] }
 0x8f7   :  { %v2513_v39 = vpop.f32.mrf.mxu1 }
 0x8f8   :  { %v1044_v39 = vpack.c.bf16 %v1037_v38, %v1036_v37  ;;  %v1247_v38 = vld [vmem:[#allocation5 + $0x168] sm:$0xff] }
 0x8fb   :  { %v862_v40 = vpop.f32.mrf.mxu0 }
 0x8fc   :  { %v870_v41 = vpack.c.bf16 %v862_v40, %v813_v36  ;;  %v1045_v36 = vpack.c.bf16 %v1039_v35, %v1038_v34  ;;  %v1034_v40 = vld [vmem:[#allocation5 + $0xd8] sm:$0xff]  ;;  %v1250_v34 = vld [vmem:[#allocation5 + $0x180] sm:$0xff]  ;;  %v1139_v35 = vld [vmem:[#allocation5 + $0x128] sm:$0xff] }
 0x8fd   :  { %v2518_v42 = vpop.f32.mrf.mxu0 }
 0x8fe   :  { %2523 = vmatmul.mubr.msk.bf16.vlgmr.msra.gmra.mxu1 %vm334_vm4, %v870_v41  ;;  %v1035_v41 = vld [vmem:[#allocation5 + $0xe0] sm:$0xff] }
 0x8ff   :  { %v865_v43 = vpop.f32.mrf.mxu0  ;;  %2542 = vmatprep.mubr.msk.bf16.mxu1 %vm2826_vm0, %v2825_v1  ;;  %2535 = vmatpush3.bf16.msra.mxu1 %v1046_v33  ;;  %v1043_v42 = vpack.c.bf16 %v1035_v41, %v1034_v40  ;;  %v1145_v33 = vpack.c.bf16 %v1142_v10, %v1141_v51 }
 0x900   :  { %2536 = vmatprep.subr.bf16.mxu1 %v2825_v1  ;;  %v2314_v43 = vld [vmem:[#allocation5 + $0x11e] ss:$0 sm:$0xff] }
 0x901   :  { %v2519_v44 = vpop.f32.mrf.mxu0 }
 0x903   :  { %2537 = vmatpush3.bf16.msra.mxu1 %v1045_v36  ;;  %v1140_v36 = vld [vmem:[#allocation5 + $0x130] sm:$0xff] }
 0x904   :  { %2538 = vmatprep.subr.bf16.mxu1 %v2825_v1  ;;  %v1144_v40 = vpack.c.bf16 %v1140_v36, %v1139_v35 }
 0x907   :  { %2539 = vmatpush3.bf16.msra.mxu1 %v1044_v39  ;;  %v1248_v39 = vld [vmem:[#allocation5 + $0x170] sm:$0xff] }
 0x908   :  { %2540 = vmatprep.subr.bf16.mxu1 %v2825_v1  ;;  %v1251_v41 = vpack.c.bf16 %v1248_v39, %v1247_v38 }
 0x90b   :  { %2541 = vmatpush3.bf16.msra.mxu1 %v1043_v42 }
 0x90c   :  { %2562 = vmatprep.subr.bf16.mxu1 %v2825_v1 }
 0x9be   :  { %v909_v47 = vpop.f32.mrf.mxu1 }
 0x9bf   :  { %v916_v48 = vadd.f32 %v909_v47, %v636_v46 }
 0x9c0   :  { %v2524_v49 = vpop.f32.mrf.mxu1 }
 0x9c1   :  { %v918_v52 = vadd.f32 %v916_v48, %v2881_v4 }
 0x9c2   :  { %v912_v53 = vpop.f32.mrf.mxu1 }
 0x9c3   :  { %v917_v54 = vadd.f32 %v912_v53, %v637_v50  ;;  %v922_v55 = vsel %vm64_vm3, %v918_v52, 0.0 }
 0x9c4   :  { %923 = vadd.xlane.f32.xlu1 %v922_v55  ;;  %v2525_v56 = vpop.f32.mrf.mxu1 }
 0x9c5   :  { %v919_v58 = vadd.f32 %v917_v54, %v2883_v5  ;;  %v966_v5 = vpack.c.bf16 %v963_v13, %v962_v12  ;;  %v2316_v13 = vld [vmem:[#allocation5 + $0x11f] ss:$0 sm:$0xff] }
 0x9c7   :  { %v925_v60 = vsel %vm64_vm3, %v919_v58, 0.0  ;;  %2527 = vmatpush3.bf16.msra.mxu0 %v966_v5 }
 0x9c8   :  { %926 = vadd.xlane.f32.xlu0 %v925_v60  ;;  %2528 = vmatprep.subr.bf16.mxu0 %v2825_v1 }
 0x9cb   :  { %2529 = vmatpush3.bf16.msra.mxu0 %v965_v16 }
 0x9cc   :  { %2546 = vmatprep.subr.bf16.mxu0 %v2825_v1 }
 0xa4d   :  { %v924_v61 = vpop.xlane.xlu1 %923 }
 0xa4e   :  { %v928_v62 = vmul.f32 0.03125, %v924_v61 }
 0xa50   :  { %v930_v0 = vsub.f32 %v918_v52, %v928_v62 }
 0xa51   :  { %v927_v2 = vpop.xlane.xlu0 %926 }
 0xa52   :  { %v929_v3 = vmul.f32 0.03125, %v927_v2  ;;  %v932_v6 = vmul.f32 %v930_v0, %v930_v0 }
 0xa54   :  { %v931_v7 = vsub.f32 %v919_v58, %v929_v3  ;;  %v934_v4 = vsel %vm64_vm3, %v932_v6, 0.0 }
 0xa55   :  { %935 = vadd.xlane.f32.xlu0 %v934_v4 }
 0xa56   :  { %v933_v8 = vmul.f32 %v931_v7, %v931_v7 }
 0xa58   :  { %v937_v9 = vsel %vm64_vm3, %v933_v8, 0.0 }
 0xa59   :  { %938 = vadd.xlane.f32.xlu1 %v937_v9 }
 0xade   :  { %v936_v17 = vpop.xlane.xlu0 %935 }
 0xadf   :  { %v940_v18 = vmul.f32 0.03125, %v936_v17 }
 0xae1   :  { %v942_v19 = vadd.f32 1e-12, %v940_v18 }
 0xae2   :  { %v939_v20 = vpop.xlane.xlu1 %938 }
 0xae3   :  { %2704 = vrsqrt.f32 %v942_v19  ;;  %v941_v21 = vmul.f32 0.03125, %v939_v20 }
 0xae5   :  { %v943_v22 = vadd.f32 1e-12, %v941_v21 }
 0xae7   :  { %2706 = vrsqrt.f32 %v943_v22 }
 0xaf0   :  { %v2705_v23 = vpop.eup %2704 }
 0xaf1   :  { %v946_v24 = vmul.f32 %v2705_v23, %v930_v0 }
 0xaf3   :  { %v952_v27 = vmul.f32 %v2312_v25, %v946_v24 }
 0xaf4   :  { %v2707_v26 = vpop.eup %2706 }
 0xaf5   :  { %v947_v57 = vmul.f32 %v2707_v26, %v931_v7  ;;  %v958_v30 = vadd.f32 %v2313_v28, %v952_v27 }
 0xaf7   :  { %v953_v29 = vmul.f32 %v2312_v25, %v947_v57 }
 0xaf9   :  { %v2989_v31 = vadd.f32 %v2313_v28, %v953_v29 }
 0xafb   :  { %v964_v32 = vpack.c.bf16 %v2989_v31, %v958_v30 }
 0xafd   :  { %2531 = vmatmul.mubr.msk.bf16.vlgmr.msra.gmra.mxu0 %vm64_vm3, %v964_v32 }
 0xafe   :  { %2550 = vmatprep.mubr.msk.bf16.mxu0 %vm2826_vm0, %v2825_v1  ;;  %2547 = vmatpush3.bf16.msra.mxu0 %v1145_v33 }
 0xaff   :  { %2548 = vmatprep.subr.bf16.mxu0 %v2825_v1 }
 0xb02   :  { %2549 = vmatpush3.bf16.msra.mxu0 %v1144_v40 }
 0xb03   :  { %2554 = vmatprep.subr.bf16.mxu0 %v2825_v1 }
 0xbbd   :  { %v1009_v44 = vpop.f32.mrf.mxu0 }
 0xbbe   :  { %v1010_v45 = vadd.f32 %v2314_v43, %v1009_v44 }
 0xbbf   :  { %v2532_v46 = vpop.f32.mrf.mxu0 }
 0xbc0   :  { %v1016_v47 = vmul.f32 %v1010_v45, %v1010_v45 }
 0xbc1   :  { %v1012_v48 = vpop.f32.mrf.mxu0 }
 0xbc2   :  { %v1018_v49 = vmul.f32 %v1016_v47, %v1010_v45  ;;  %v1013_v50 = vadd.f32 %v2314_v43, %v1012_v48 }
 0xbc3   :  { %v2533_v52 = vpop.f32.mrf.mxu0 }
 0xbc4   :  { %v1020_v53 = vmul.f32 0.044715, %v1018_v49  ;;  %v1017_v54 = vmul.f32 %v1013_v50, %v1013_v50 }
 0xbc6   :  { %v1022_v55 = vadd.f32 %v1020_v53, %v1010_v45  ;;  %v1019_v56 = vmul.f32 %v1017_v54, %v1013_v50 }
 0xbc8   :  { %v1024_v58 = vmul.f32 0.7978846, %v1022_v55  ;;  %v1021_v60 = vmul.f32 0.044715, %v1019_v56  ;;  %v2319_v55 = vld [vmem:[#allocation5 + $0x121] ss:$0 sm:$0xff] }
 0xbca   :  { %2708 = vtanh.f32 %v1024_v58  ;;  %v1023_v61 = vadd.f32 %v1021_v60, %v1013_v50  ;;  %v1197_v58 = vld [vmem:[#allocation5 + $0x158] sm:$0xff]  ;;  %v1198_v60 = vld [vmem:[#allocation5 + $0x160] sm:$0xff] }
 0xbcc   :  { %v1025_v62 = vmul.f32 0.7978846, %v1023_v61 }
 0xbce   :  { %2710 = vtanh.f32 %v1025_v62 }
 0xbd7   :  { %v2709_v0 = vpop.eup %2708 }
 0xbd8   :  { %v1028_v2 = vadd.f32 1.0, %v2709_v0  ;;  %v1200_v0 = vpack.c.bf16 %v1198_v60, %v1197_v58 }
 0xbda   :  { %v1030_v6 = vmul.f32 0.5, %v1028_v2 }
 0xbdb   :  { %v2711_v3 = vpop.eup %2710 }
 0xbdc   :  { %v1029_v7 = vadd.f32 1.0, %v2711_v3  ;;  %v1032_v8 = vmul.f32 %v1030_v6, %v1010_v45  ;;  %v1195_v3 = vld [vmem:[#allocation5 + $0x148] sm:$0xff]  ;;  %v1196_v6 = vld [vmem:[#allocation5 + $0x150] sm:$0xff] }
 0xbde   :  { %v1031_v4 = vmul.f32 0.5, %v1029_v7  ;;  %v1199_v7 = vpack.c.bf16 %v1196_v6, %v1195_v3 }
 0xbe0   :  { %v1033_v9 = vmul.f32 %v1031_v4, %v1013_v50  ;;  %v2318_v50 = vld [vmem:[#allocation5 + $0x120] ss:$0 sm:$0xff] }
 0xbe2   :  { %v1042_v12 = vpack.c.bf16 %v1033_v9, %v1032_v8 }
 0xbe4   :  { %2543 = vmatmul.mubr.msk.bf16.vlgmr.msra.gmra.mxu1 %vm1052_vm7, %v1042_v12 }
 0xbe5   :  { %2566 = vmatprep.mubr.msk.bf16.mxu1 %vm2826_vm0, %v2825_v1 }
 0xca4   :  { %v1090_v5 = vpop.f32.mrf.mxu1 }
 0xca5   :  { %v1091_v14 = vadd.f32 %v2316_v13, %v1090_v5 }
 0xca6   :  { %v2544_v15 = vpop.f32.mrf.mxu1 }
 0xca7   :  { %v1097_v16 = vadd.f32 %v1091_v14, %v958_v30 }
 0xca8   :  { %v1093_v17 = vpop.f32.mrf.mxu1 }
 0xca9   :  { %v1094_v18 = vadd.f32 %v2316_v13, %v1093_v17  ;;  %v1101_v19 = vsel %vm64_vm3, %v1097_v16, 0.0 }
 0xcaa   :  { %1102 = vadd.xlane.f32.xlu0 %v1101_v19  ;;  %v2545_v20 = vpop.f32.mrf.mxu1  ;;  %v2324_v19 = vld [vmem:[#allocation5 + $0x20a] ss:$0 sm:$0xff] }
 0xcab   :  { %v1098_v21 = vadd.f32 %v1094_v18, %v2989_v31  ;;  %v1249_v31 = vld [vmem:[#allocation5 + $0x178] sm:$0xff] }
 0xcac   :  { %v1252_v37 = vpack.c.bf16 %v1250_v34, %v1249_v31 }
 0xcad   :  { %v1104_v22 = vsel %vm64_vm3, %v1098_v21, 0.0 }
 0xcae   :  { %1105 = vadd.xlane.f32.xlu1 %v1104_v22  ;;  %2563 = vmatpush3.bf16.msra.mxu1 %v1252_v37  ;;  %v2320_v22 = vld [vmem:[#allocation5 + $0x208] ss:$0 sm:$0xff] }
 0xcaf   :  { %2564 = vmatprep.subr.bf16.mxu1 %v2825_v1 }
 0xcb2   :  { %2565 = vmatpush3.bf16.msra.mxu1 %v1251_v41 }
 0xcb3   :  { %2576 = vmatprep.subr.bf16.mxu1 %v2825_v1 }
 0xd33   :  { %v1103_v23 = vpop.xlane.xlu0 %1102 }
 0xd34   :  { %v1107_v24 = vmul.f32 0.03125, %v1103_v23 }
 0xd36   :  { %v1109_v25 = vsub.f32 %v1097_v16, %v1107_v24  ;;  %v2322_v16 = vld [vmem:[#allocation5 + $0x209] ss:$0 sm:$0xff] }
 0xd37   :  { %v1106_v26 = vpop.xlane.xlu1 %1105 }
 0xd38   :  { %v1108_v57 = vmul.f32 0.03125, %v1106_v26  ;;  %v1111_v27 = vmul.f32 %v1109_v25, %v1109_v25 }
 0xd3a   :  { %v1110_v28 = vsub.f32 %v1098_v21, %v1108_v57  ;;  %v1113_v29 = vsel %vm64_vm3, %v1111_v27, 0.0 }
 0xd3b   :  { %1114 = vadd.xlane.f32.xlu0 %v1113_v29 }
 0xd3c   :  { %v1112_v30 = vmul.f32 %v1110_v28, %v1110_v28 }
 0xd3e   :  { %v1116_v32 = vsel %vm64_vm3, %v1112_v30, 0.0 }
 0xd3f   :  { %1117 = vadd.xlane.f32.xlu1 %v1116_v32 }
 0xdc4   :  { %v1115_v42 = vpop.xlane.xlu0 %1114 }
 0xdc5   :  { %v1119_v43 = vmul.f32 0.03125, %v1115_v42 }
 0xdc7   :  { %v1121_v44 = vadd.f32 1e-12, %v1119_v43 }
 0xdc8   :  { %v1118_v45 = vpop.xlane.xlu1 %1117 }
 0xdc9   :  { %2712 = vrsqrt.f32 %v1121_v44  ;;  %v1120_v46 = vmul.f32 0.03125, %v1118_v45 }
 0xdcb   :  { %v1122_v47 = vadd.f32 1e-12, %v1120_v46 }
 0xdcd   :  { %2714 = vrsqrt.f32 %v1122_v47 }
 0xdd6   :  { %v2713_v48 = vpop.eup %2712 }
 0xdd7   :  { %v1125_v49 = vmul.f32 %v2713_v48, %v1109_v25 }
 0xdd9   :  { %v1131_v54 = vmul.f32 %v2318_v50, %v1125_v49 }
 0xdda   :  { %v2715_v52 = vpop.eup %2714 }
 0xddb   :  { %v1126_v53 = vmul.f32 %v2715_v52, %v1110_v28  ;;  %v3011_v61 = vadd.f32 %v2319_v55, %v1131_v54 }
 0xddd   :  { %v1132_v56 = vmul.f32 %v2318_v50, %v1126_v53 }
 0xddf   :  { %v3013_v62 = vadd.f32 %v2319_v55, %v1132_v56 }
 0xde1   :  { %v1143_v2 = vpack.c.bf16 %v3013_v62, %v3011_v61 }
 0xde3   :  { %2551 = vmatmul.mubr.msk.bf16.vlgmr.msra.gmra.mxu0 %vm64_vm3, %v1143_v2  ;;  %2567 = vmatmul.mubr.msk.bf16.vlgmr.msra.gmra.mxu1 %vm64_vm3, %v1143_v2 }
 0xde4   :  { %2555 = vmatpush3.bf16.msra.mxu0 %v1200_v0  ;;  %2558 = vmatprep.mubr.msk.bf16.mxu0 %vm2826_vm0, %v2825_v1 }
 0xde5   :  { %2556 = vmatprep.subr.bf16.mxu0 %v2825_v1  ;;  %2578 = vmatprep.mubr.msk.bf16.mxu1 %vm2826_vm0, %v2825_v1 }
 0xde8   :  { %2557 = vmatpush3.bf16.msra.mxu0 %v1199_v7 }
 0xde9   :  { %2570 = vmatprep.subr.bf16.mxu0 %v2825_v1 }
 0xdeb   :  { %2559 = vmatmul.mubr.msk.bf16.vlgmr.msra.gmra.mxu0 %vm64_vm3, %v1143_v2 }
 0xdec   :  { %2572 = vmatprep.mubr.msk.bf16.mxu0 %vm2826_vm0, %v2825_v1 }
 0xea3   :  { %v1188_v4 = vpop.f32.mrf.mxu0  ;;  %v1292_v8 = vpop.f32.mrf.mxu1 }
 0xea4   :  { %v1293_v24 = vadd.f32 %v2324_v19, %v1292_v8  ;;  %v1189_v27 = vadd.f32 %v2320_v22, %v1188_v4 }
 0xea5   :  { %v2552_v9 = vpop.f32.mrf.mxu0  ;;  %v2568_v12 = vpop.f32.mrf.mxu1 }
 0xea6   :  { %v3030_v29 = vpack.c.bf16 %v1293_v24, %v1293_v24  ;;  %v1305_v51 = vpack.c.bf16 %v1189_v27, %v1189_v27 }
 0xea7   :  { %v1191_v13 = vpop.f32.mrf.mxu0  ;;  %v1295_v5 = vpop.f32.mrf.mxu1 }
 0xea8   :  { %v1296_v30 = vadd.f32 %v2324_v19, %v1295_v5  ;;  %v1192_v10 = vadd.f32 %v2320_v22, %v1191_v13  ;;  %v1435_v31 = vsel %vm498_vm5, %v3030_v29, 0 }
 0xea9   :  { %v2553_v14 = vpop.f32.mrf.mxu0  ;;  %v2569_v15 = vpop.f32.mrf.mxu1 }
 0xeaa   :  { %v3036_v33 = vpack.c.bf16 %v1296_v30, %v1296_v30  ;;  %v1306_v34 = vpack.c.bf16 %v1192_v10, %v1192_v10 }
 0xeab   :  { %v1240_v17 = vpop.f32.mrf.mxu0 }
 0xeac   :  { %v1241_v18 = vadd.f32 %v2322_v16, %v1240_v17  ;;  %v1481_v35 = vsel %vm498_vm5, %v3036_v33, 0  ;;  %v1523_v17 = vld [vmem:[#allocation5 + $0x188] sm:$0xff] }
 0xead   :  { %v2560_v20 = vpop.f32.mrf.mxu0 }
 0xeae   :  { %v1307_v21 = vpack.c.bf16 %v1241_v18, %v1241_v18  ;;  %v1524_v18 = vld [vmem:[#allocation5 + $0x190] sm:$0xff] }
 0xeaf   :  { %v1243_v23 = vpop.f32.mrf.mxu0  ;;  %v1526_v19 = vpack.c.bf16 %v1524_v18, %v1523_v17 }
 0xeb0   :  { %v1313_v25 = vsel %vm334_vm4, %v1307_v21, 0  ;;  %v1244_v26 = vadd.f32 %v2322_v16, %v1243_v23 }
 0xeb1   :  { %v2561_v57 = vpop.f32.mrf.mxu0  ;;  %2571 = vmatpush3.bf16.xpose.msra.mxu0 %v1313_v25 }
 0xeb2   :  { %v1308_v28 = vpack.c.bf16 %v1244_v26, %v1244_v26  ;;  %2582 = vmatprep.subr.bf16.mxu0 %v2825_v1 }
 0xeb4   :  { %v1359_v32 = vsel %vm334_vm4, %v1308_v28, 0 }
 0xeb5   :  { %2577 = vmatpush3.bf16.xpose.msra.mxu1 %v1359_v32 }
 0xeb6   :  { %2588 = vmatprep.subr.bf16.mxu1 %v2825_v1 }
 0xeb8   :  { %2573 = vmatmul.mubr.msk.bf16.vlgmr.msra.gmra.mxu0 %vm334_vm4, %v1305_v51 }
 0xeb9   :  { %2583 = vmatpush3.bf16.msra.mxu0 %v1435_v31  ;;  %2584 = vmatprep.mubr.msk.bf16.mxu0 %vm2826_vm0, %v2825_v1 }
 0xeba   :  { %2594 = vmatprep.subr.bf16.mxu0 %v2825_v1 }
 0xebc   :  { %2579 = vmatmul.mubr.msk.bf16.vlgmr.msra.gmra.mxu1 %vm334_vm4, %v1306_v34 }
 0xebd   :  { %2589 = vmatpush3.bf16.msra.mxu1 %v1481_v35  ;;  %2590 = vmatprep.mubr.msk.bf16.mxu1 %vm2826_vm0, %v2825_v1 }
 0xebe   :  { %2600 = vmatprep.subr.bf16.mxu1 %v2825_v1 }
 0xf78   :  { %v1349_v36 = vpop.f32.mrf.mxu0 }
 0xf79   :  { %v1401_v37 = vmul.f32 0.25, %v1349_v36 }
 0xf7a   :  { %v2574_v38 = vpop.f32.mrf.mxu0 }
 0xf7b   :  { %v1403_v39 = vadd.f32 %v1401_v37, %v2922_v59 }
 0xf7c   :  { %v1352_v40 = vpop.f32.mrf.mxu0  ;;  %v1395_v41 = vpop.f32.mrf.mxu1 }
 0xf7d   :  { %v1402_v42 = vmul.f32 0.25, %v1395_v41  ;;  %v1405_v43 = vsel %vm468_vm6, %v1403_v39, -inf }
 0xf7e   :  { %v2580_v44 = vpop.f32.mrf.mxu1  ;;  %1406 = vmax.xlane.f32.xlu0 %v1405_v43  ;;  %v2575_v45 = vpop.f32.mrf.mxu0 }
 0xf7f   :  { %v1404_v46 = vadd.f32 %v1402_v42, %v2924_v63 }
 0xf80   :  { %v1398_v47 = vpop.f32.mrf.mxu1 }
 0xf81   :  { %v1408_v48 = vsel %vm468_vm6, %v1404_v46, -inf }
 0xf82   :  { %1409 = vmax.xlane.f32.xlu1 %v1408_v48  ;;  %v2581_v49 = vpop.f32.mrf.mxu1 }
0x1007   :  { %v1407_v50 = vpop.xlane.xlu0 %1406 }
0x1008   :  { %v1411_v52 = vsub.f32 %v1403_v39, %v1407_v50 }
0x100a   :  { %v1413_v53 = vmul.f32 1.442695, %v1411_v52 }
0x100b   :  { %v1410_v54 = vpop.xlane.xlu1 %1409 }
0x100c   :  { %2716 = vpow2.f32 %v1413_v53  ;;  %v1412_v55 = vsub.f32 %v1404_v46, %v1410_v54 }
0x100e   :  { %v1415_v56 = vmul.f32 1.442695, %v1412_v55 }
0x1010   :  { %2718 = vpow2.f32 %v1415_v56 }
0x1019   :  { %v2717_v58 = vpop.eup %2716 }
0x101a   :  { %v1417_v60 = vsel %vm468_vm6, %v2717_v58, 0.0 }
0x101b   :  { %1418 = vadd.xlane.f32.xlu0 %v1417_v60 }
0x101d   :  { %v2719_v0 = vpop.eup %2718 }
0x101e   :  { %v1420_v2 = vsel %vm468_vm6, %v2719_v0, 0.0 }
0x101f   :  { %1421 = vadd.xlane.f32.xlu1 %v1420_v2 }
0x1030   :  { %1629 = vrot.lane.b32.xlu1 %v1308_v28, %s2829_s1 }
0x1031   :  { %1577 = vrot.lane.b32.xlu0 %v1307_v21, %s2829_s1 }
0x1034   :  { %1574 = vrot.lane.b32.xlu1 %v1305_v51, %s2829_s1 }
0x1035   :  { %1626 = vrot.lane.b32.xlu0 %v1306_v34, %s2829_s1 }
0x10a4   :  { %v1419_v3 = vpop.xlane.xlu0 %1418 }
0x10a5   :  { %2720 = vrcp.f32 %v1419_v3 }
0x10a8   :  { %v1422_v6 = vpop.xlane.xlu1 %1421  ;;  %v1578_v13 = vpop.permute.xlu0 %1577 }
0x10a9   :  { %2722 = vrcp.f32 %v1422_v6  ;;  %v1583_v14 = vsel %vm334_vm4, %v1578_v13, 0 }
0x10ac   :  { %v1630_v15 = vpop.permute.xlu1 %1629  ;;  %v1627_v51 = vpop.permute.xlu0 %1626 }
0x10ad   :  { %v1635_v57 = vsel %vm334_vm4, %v1630_v15, 0 }
0x10b0   :  { %v1575_v16 = vpop.permute.xlu1 %1574 }
0x10b2   :  { %v2721_v7 = vpop.eup %2720 }
0x10b3   :  { %v1424_v4 = vmul.f32 %v2721_v7, %v2717_v58  ;;  %v1804_v7 = vld [vmem:[#allocation5 + $0x1a0] sm:$0xff] }
0x10b5   :  { %v1427_v8 = vpack.c.bf16 %v1424_v4, %v1424_v4 }
0x10b6   :  { %v2723_v9 = vpop.eup %2722 }
0x10b7   :  { %2585 = vmatmul.mubr.msk.bf16.vlgmr.msra.gmra.mxu0 %vm468_vm6, %v1427_v8  ;;  %v1426_v12 = vmul.f32 %v2723_v9, %v2719_v0 }
0x10b8   :  { %2596 = vmatprep.mubr.msk.bf16.mxu0 %vm2826_vm0, %v2825_v1  ;;  %2595 = vmatpush3.bf16.msra.mxu0 %v1526_v19 }
0x10b9   :  { %v1428_v5 = vpack.c.bf16 %v1426_v12, %v1426_v12  ;;  %2606 = vmatprep.subr.bf16.mxu0 %v2825_v1 }
0x10bb   :  { %2591 = vmatmul.mubr.msk.bf16.vlgmr.msra.gmra.mxu1 %vm468_vm6, %v1428_v5 }
0x10bc   :  { %2601 = vmatpush3.bf16.xpose.msra.mxu1 %v1583_v14  ;;  %2602 = vmatprep.mubr.msk.bf16.mxu1 %vm2826_vm0, %v2825_v1 }
0x10bd   :  { %2612 = vmatprep.subr.bf16.mxu1 %v2825_v1 }
0x10c3   :  { %2603 = vmatmul.mubr.msk.bf16.vlgmr.msra.gmra.mxu1 %vm334_vm4, %v1575_v16 }
0x10c4   :  { %2614 = vmatprep.mubr.msk.bf16.mxu1 %vm2826_vm0, %v2825_v1 }
0x1177   :  { %v1471_v20 = vpop.f32.mrf.mxu0 }
0x1179   :  { %v2586_v21 = vpop.f32.mrf.mxu0 }
0x117b   :  { %v1474_v22 = vpop.f32.mrf.mxu0  ;;  %v1517_v23 = vpop.f32.mrf.mxu1 }
0x117c   :  { %v1525_v24 = vpack.c.bf16 %v1517_v23, %v1471_v20  ;;  %v2326_v23 = vld [vmem:[#allocation5 + $0x20b] ss:$0 sm:$0xff] }
0x117d   :  { %v2587_v25 = vpop.f32.mrf.mxu0  ;;  %v2592_v26 = vpop.f32.mrf.mxu1 }
0x117e   :  { %2597 = vmatmul.mubr.msk.bf16.vlgmr.msra.gmra.mxu0 %vm334_vm4, %v1525_v24 }
0x117f   :  { %2607 = vmatpush3.bf16.xpose.msra.mxu0 %v1635_v57  ;;  %v1520_v27 = vpop.f32.mrf.mxu1  ;;  %2608 = vmatprep.mubr.msk.bf16.mxu0 %vm2826_vm0, %v2825_v1 }
0x1180   :  { %2618 = vmatprep.subr.bf16.mxu0 %v2825_v1 }
0x1181   :  { %v2593_v28 = vpop.f32.mrf.mxu1 }
0x1183   :  { %v1619_v30 = vpop.f32.mrf.mxu1 }
0x1184   :  { %v1677_v32 = vmul.f32 0.25, %v1619_v30 }
0x1185   :  { %v2604_v10 = vpop.f32.mrf.mxu1 }
0x1186   :  { %2609 = vmatmul.mubr.msk.bf16.vlgmr.msra.gmra.mxu0 %vm334_vm4, %v1627_v51  ;;  %v1679_v31 = vadd.f32 %v1677_v32, %v2922_v59 }
0x1187   :  { %v1622_v34 = vpop.f32.mrf.mxu1  ;;  %2620 = vmatprep.mubr.msk.bf16.mxu0 %vm2826_vm0, %v2825_v1 }
0x1188   :  { %v1681_v35 = vsel %vm468_vm6, %v1679_v31, -inf }
0x1189   :  { %1682 = vmax.xlane.f32.xlu1 %v1681_v35  ;;  %v2605_v36 = vpop.f32.mrf.mxu1 }
0x1212   :  { %v1683_v37 = vpop.xlane.xlu1 %1682 }
0x1213   :  { %v1687_v38 = vsub.f32 %v1679_v31, %v1683_v37 }
0x1215   :  { %v1689_v39 = vmul.f32 1.442695, %v1687_v38 }
0x1217   :  { %2724 = vpow2.f32 %v1689_v39 }
0x1224   :  { %v2725_v49 = vpop.eup %2724 }
0x1225   :  { %v1693_v52 = vsel %vm468_vm6, %v2725_v49, 0.0 }
0x123e   :  { %v3080_v40 = vpop.f32.mrf.mxu0 }
0x123f   :  { %v1571_v24 = vadd.f32 %v2326_v23, %v3080_v40 }
0x1240   :  { %v2598_v41 = vpop.f32.mrf.mxu0 }
0x1242   :  { %v3082_v42 = vpop.f32.mrf.mxu0 }
0x1243   :  { %v1572_v27 = vadd.f32 %v2326_v23, %v3082_v42 }
0x1244   :  { %v2599_v43 = vpop.f32.mrf.mxu0 }
0x1246   :  { %v1671_v44 = vpop.f32.mrf.mxu0 }
0x1247   :  { %v1678_v59 = vmul.f32 0.25, %v1671_v44  ;;  %v1897_v44 = vld [vmem:[#allocation5 + $0x1b8] sm:$0xff] }
0x1248   :  { %v2610_v45 = vpop.f32.mrf.mxu0 }
0x1249   :  { %v1680_v46 = vadd.f32 %v1678_v59, %v2924_v63  ;;  %v1898_v59 = vld [vmem:[#allocation5 + $0x1c0] sm:$0xff]  ;;  %v1895_v45 = vld [vmem:[#allocation5 + $0x1a8] sm:$0xff] }
0x124a   :  { %v1674_v47 = vpop.f32.mrf.mxu0 }
0x124b   :  { %v1684_v48 = vsel %vm468_vm6, %v1680_v46, -inf }
0x124c   :  { %1685 = vmax.xlane.f32.xlu0 %v1684_v48  ;;  %v2611_v50 = vpop.f32.mrf.mxu0 }
0x1250   :  { %1694 = vadd.xlane.f32.xlu0 %v1693_v52 }
0x1266   :  { %1706 = vrot.lane.b32.xlu0 %v3030_v29, %s2829_s1  ;;  %v1803_v29 = vld [vmem:[#allocation5 + $0x198] sm:$0xff] }
0x1267   :  { %v1806_v4 = vpack.c.bf16 %v1804_v7, %v1803_v29 }
0x12d5   :  { %v1686_v53 = vpop.xlane.xlu0 %1685 }
0x12d6   :  { %v1688_v54 = vsub.f32 %v1680_v46, %v1686_v53  ;;  %v1896_v46 = vld [vmem:[#allocation5 + $0x1b0] sm:$0xff] }
0x12d7   :  { %v1900_v47 = vpack.c.bf16 %v1896_v46, %v1895_v45 }
0x12d8   :  { %v1691_v55 = vmul.f32 1.442695, %v1688_v54 }
0x12d9   :  { %v1695_v56 = vpop.xlane.xlu0 %1694 }
0x12da   :  { %2726 = vpow2.f32 %v1691_v55 }
0x12db   :  { %2728 = vrcp.f32 %v1695_v56 }
0x12dd   :  { %v1707_v58 = vpop.permute.xlu0 %1706 }
0x12de   :  { %v1712_v63 = vsel %vm498_vm5, %v1707_v58, 0  ;;  %v2337_v58 = vld [vmem:[#allocation5 + $0x20c] ss:$0 sm:$0xff] }
0x12df   :  { %2613 = vmatpush3.bf16.msra.mxu1 %v1712_v63 }
0x12e0   :  { %2624 = vmatprep.subr.bf16.mxu1 %v2825_v1 }
0x12e7   :  { %v2727_v60 = vpop.eup %2726 }
0x12e8   :  { %v2729_v0 = vpop.eup %2728  ;;  %v1696_v2 = vsel %vm468_vm6, %v2727_v60, 0.0 }
0x12e9   :  { %1697 = vadd.xlane.f32.xlu1 %v1696_v2  ;;  %v1700_v3 = vmul.f32 %v2729_v0, %v2725_v49  ;;  %v2338_v2 = vld [vmem:[#allocation5 + $0x20d] ss:$0 sm:$0xff] }
0x12eb   :  { %v1703_v6 = vpack.c.bf16 %v1700_v3, %v1700_v3 }
0x12ed   :  { %2615 = vmatmul.mubr.msk.bf16.vlgmr.msra.gmra.mxu1 %vm468_vm6, %v1703_v6 }
0x12ee   :  { %2626 = vmatprep.mubr.msk.bf16.mxu1 %vm2826_vm0, %v2825_v1  ;;  %2625 = vmatpush3.bf16.msra.mxu1 %v1806_v4  ;;  %v1975_v4 = vld [vmem:[#allocation5 + $0x1f8] sm:$0xff] }
0x12ef   :  { %2638 = vmatprep.subr.bf16.mxu1 %v2825_v1 }
0x12fa   :  { %1755 = vrot.lane.b32.xlu1 %v3036_v33, %s2829_s1 }
0x1372   :  { %v1698_v8 = vpop.xlane.xlu1 %1697 }
0x1373   :  { %2730 = vrcp.f32 %v1698_v8  ;;  %v1976_v8 = vld [vmem:[#allocation5 + $0x200] sm:$0xff] }
0x1376   :  { %v1756_v9 = vpop.permute.xlu1 %1755 }
0x1377   :  { %v1761_v12 = vsel %vm498_vm5, %v1756_v9, 0  ;;  %v1981_v9 = vpack.c.bf16 %v1976_v8, %v1975_v4  ;;  %v2074_v8 = vld [vmem:[#allocation5 + $0x220] sm:$0xff] }
0x1378   :  { %2619 = vmatpush3.bf16.msra.mxu0 %v1761_v12  ;;  %v1973_v12 = vld [vmem:[#allocation5 + $0x1e8] sm:$0xff] }
0x1379   :  { %2630 = vmatprep.subr.bf16.mxu0 %v2825_v1 }
0x1380   :  { %v2731_v13 = vpop.eup %2730 }
0x1381   :  { %v1702_v5 = vmul.f32 %v2731_v13, %v2727_v60  ;;  %v1974_v13 = vld [vmem:[#allocation5 + $0x1f0] sm:$0xff] }
0x1383   :  { %v1704_v14 = vpack.c.bf16 %v1702_v5, %v1702_v5  ;;  %v1980_v5 = vpack.c.bf16 %v1974_v13, %v1973_v12 }
0x1385   :  { %2621 = vmatmul.mubr.msk.bf16.vlgmr.msra.gmra.mxu0 %vm468_vm6, %v1704_v14  ;;  %v1971_v14 = vld [vmem:[#allocation5 + $0x1d8] sm:$0xff] }
0x1386   :  { %2634 = vmatprep.mubr.msk.bf16.mxu0 %vm2826_vm0, %v2825_v1 }
0x13ad   :  { %v1748_v33 = vpop.f32.mrf.mxu1 }
0x13af   :  { %v2616_v15 = vpop.f32.mrf.mxu1 }
0x13b1   :  { %v1751_v16 = vpop.f32.mrf.mxu1 }
0x13b2   :  { %v1969_v16 = vld [vmem:[#allocation5 + $0x1c8] sm:$0xff] }
0x13b3   :  { %v2617_v17 = vpop.f32.mrf.mxu1 }
0x13b4   :  { %v1970_v17 = vld [vmem:[#allocation5 + $0x1d0] sm:$0xff] }
0x1445   :  { %v1797_v18 = vpop.f32.mrf.mxu0 }
0x1446   :  { %v1805_v19 = vpack.c.bf16 %v1797_v18, %v1748_v33  ;;  %v1972_v33 = vld [vmem:[#allocation5 + $0x1e0] sm:$0xff]  ;;  %v1978_v18 = vpack.c.bf16 %v1970_v17, %v1969_v16  ;;  %v2343_v17 = vld [vmem:[#allocation5 + $0x210] ss:$0 sm:$0xff] }
0x1447   :  { %v2622_v20 = vpop.f32.mrf.mxu0  ;;  %v1979_v15 = vpack.c.bf16 %v1972_v33, %v1971_v14 }
0x1448   :  { %2627 = vmatmul.mubr.msk.bf16.vlgmr.msra.gmra.mxu1 %vm334_vm4, %v1805_v19  ;;  %v2339_v19 = vld [vmem:[#allocation5 + $0x20e] ss:$0 sm:$0xff] }
0x1449   :  { %v1800_v21 = vpop.f32.mrf.mxu0  ;;  %2646 = vmatprep.mubr.msk.bf16.mxu1 %vm2826_vm0, %v2825_v1  ;;  %2639 = vmatpush3.bf16.msra.mxu1 %v1981_v9 }
0x144a   :  { %2640 = vmatprep.subr.bf16.mxu1 %v2825_v1 }
0x144b   :  { %v2623_v22 = vpop.f32.mrf.mxu0 }
0x144d   :  { %2641 = vmatpush3.bf16.msra.mxu1 %v1980_v5 }
0x144e   :  { %2642 = vmatprep.subr.bf16.mxu1 %v2825_v1 }
0x1451   :  { %2643 = vmatpush3.bf16.msra.mxu1 %v1979_v15 }
0x1452   :  { %2644 = vmatprep.subr.bf16.mxu1 %v2825_v1 }
0x1455   :  { %2645 = vmatpush3.bf16.msra.mxu1 %v1978_v18 }
0x1508   :  { %v1844_v25 = vpop.f32.mrf.mxu1 }
0x1509   :  { %v1851_v26 = vadd.f32 %v1844_v25, %v1571_v24 }
0x150a   :  { %v2628_v57 = vpop.f32.mrf.mxu1 }
0x150b   :  { %v1853_v28 = vadd.f32 %v1851_v26, %v3011_v61 }
0x150c   :  { %v1847_v30 = vpop.f32.mrf.mxu1 }
0x150d   :  { %v1852_v32 = vadd.f32 %v1847_v30, %v1572_v27  ;;  %v1857_v51 = vsel %vm64_vm3, %v1853_v28, 0.0 }
0x150e   :  { %1858 = vadd.xlane.f32.xlu1 %v1857_v51  ;;  %v2629_v10 = vpop.f32.mrf.mxu1 }
0x150f   :  { %v1854_v31 = vadd.f32 %v1852_v32, %v3013_v62  ;;  %v1901_v62 = vpack.c.bf16 %v1898_v59, %v1897_v44 }
0x1511   :  { %v1860_v34 = vsel %vm64_vm3, %v1854_v31, 0.0  ;;  %2631 = vmatpush3.bf16.msra.mxu0 %v1901_v62 }
0x1512   :  { %1861 = vadd.xlane.f32.xlu0 %v1860_v34  ;;  %2632 = vmatprep.subr.bf16.mxu0 %v2825_v1 }
0x1515   :  { %2633 = vmatpush3.bf16.msra.mxu0 %v1900_v47 }
0x1516   :  { %2650 = vmatprep.subr.bf16.mxu0 %v2825_v1 }
0x1597   :  { %v1859_v35 = vpop.xlane.xlu1 %1858 }
0x1598   :  { %v1863_v36 = vmul.f32 0.03125, %v1859_v35 }
0x159a   :  { %v1865_v37 = vsub.f32 %v1853_v28, %v1863_v36 }
0x159b   :  { %v1862_v38 = vpop.xlane.xlu0 %1861 }
0x159c   :  { %v1864_v39 = vmul.f32 0.03125, %v1862_v38  ;;  %v1867_v40 = vmul.f32 %v1865_v37, %v1865_v37 }
0x159e   :  { %v1866_v41 = vsub.f32 %v1854_v31, %v1864_v39  ;;  %v1869_v61 = vsel %vm64_vm3, %v1867_v40, 0.0 }
0x159f   :  { %1870 = vadd.xlane.f32.xlu0 %v1869_v61 }
0x15a0   :  { %v1868_v42 = vmul.f32 %v1866_v41, %v1866_v41 }
0x15a2   :  { %v1872_v43 = vsel %vm64_vm3, %v1868_v42, 0.0 }
0x15a3   :  { %1873 = vadd.xlane.f32.xlu1 %v1872_v43  ;;  %v2341_v43 = vld [vmem:[#allocation5 + $0x20f] ss:$0 sm:$0xff] }
0x1628   :  { %v1871_v48 = vpop.xlane.xlu0 %1870 }
0x1629   :  { %v1875_v49 = vmul.f32 0.03125, %v1871_v48 }
0x162b   :  { %v1877_v50 = vadd.f32 1e-12, %v1875_v49 }
0x162c   :  { %v1874_v52 = vpop.xlane.xlu1 %1873 }
0x162d   :  { %2732 = vrsqrt.f32 %v1877_v50  ;;  %v1876_v53 = vmul.f32 0.03125, %v1874_v52 }
0x162f   :  { %v1878_v54 = vadd.f32 1e-12, %v1876_v53 }
0x1631   :  { %2734 = vrsqrt.f32 %v1878_v54 }
0x163a   :  { %v2733_v55 = vpop.eup %2732 }
0x163b   :  { %v1881_v56 = vmul.f32 %v2733_v55, %v1865_v37 }
0x163d   :  { %v1887_v0 = vmul.f32 %v2337_v58, %v1881_v56 }
0x163e   :  { %v2735_v63 = vpop.eup %2734 }
0x163f   :  { %v1882_v60 = vmul.f32 %v2735_v63, %v1866_v41  ;;  %v1893_v6 = vadd.f32 %v2338_v2, %v1887_v0 }
0x1641   :  { %v1888_v3 = vmul.f32 %v2337_v58, %v1882_v60 }
0x1643   :  { %v1894_v29 = vadd.f32 %v2338_v2, %v1888_v3 }
0x1645   :  { %v1899_v7 = vpack.c.bf16 %v1894_v29, %v1893_v6 }
0x1647   :  { %2635 = vmatmul.mubr.msk.bf16.vlgmr.msra.gmra.mxu0 %vm64_vm3, %v1899_v7  ;;  %v2076_v7 = vld [vmem:[#allocation5 + $0x230] sm:$0xff] }
0x1648   :  { %2654 = vmatprep.mubr.msk.bf16.mxu0 %vm2826_vm0, %v2825_v1 }
0x1707   :  { %v1944_v20 = vpop.f32.mrf.mxu0 }
0x1708   :  { %v1945_v21 = vadd.f32 %v2339_v19, %v1944_v20 }
0x1709   :  { %v2636_v22 = vpop.f32.mrf.mxu0 }
0x170a   :  { %v1951_v23 = vmul.f32 %v1945_v21, %v1945_v21 }
0x170b   :  { %v1947_v24 = vpop.f32.mrf.mxu0 }
0x170c   :  { %v1953_v25 = vmul.f32 %v1951_v23, %v1945_v21  ;;  %v1948_v26 = vadd.f32 %v2339_v19, %v1947_v24 }
0x170d   :  { %v2637_v57 = vpop.f32.mrf.mxu0 }
0x170e   :  { %v1955_v27 = vmul.f32 0.044715, %v1953_v25  ;;  %v1952_v28 = vmul.f32 %v1948_v26, %v1948_v26 }
0x1710   :  { %v1957_v30 = vadd.f32 %v1955_v27, %v1945_v21  ;;  %v1954_v32 = vmul.f32 %v1952_v28, %v1948_v26 }
0x1712   :  { %v1959_v51 = vmul.f32 0.7978846, %v1957_v30  ;;  %v1956_v10 = vmul.f32 0.044715, %v1954_v32 }
0x1714   :  { %2736 = vtanh.f32 %v1959_v51  ;;  %v1958_v31 = vadd.f32 %v1956_v10, %v1948_v26  ;;  %v2140_v10 = vld [vmem:[#allocation5 + $0x250] sm:$0xff] }
0x1716   :  { %v1960_v34 = vmul.f32 0.7978846, %v1958_v31  ;;  %v2141_v31 = vld [vmem:[#allocation5 + $0x258] sm:$0xff] }
0x1718   :  { %2738 = vtanh.f32 %v1960_v34  ;;  %v2144_v34 = vpack.c.bf16 %v2141_v31, %v2140_v10 }
0x1721   :  { %v2737_v35 = vpop.eup %2736 }
0x1722   :  { %v1963_v36 = vadd.f32 1.0, %v2737_v35  ;;  %v2138_v35 = vld [vmem:[#allocation5 + $0x240] sm:$0xff] }
0x1724   :  { %v1965_v38 = vmul.f32 0.5, %v1963_v36  ;;  %v2139_v36 = vld [vmem:[#allocation5 + $0x248] sm:$0xff] }
0x1725   :  { %v2739_v37 = vpop.eup %2738 }
0x1726   :  { %v1964_v39 = vadd.f32 1.0, %v2739_v37  ;;  %v1967_v41 = vmul.f32 %v1965_v38, %v1945_v21  ;;  %v2344_v21 = vld [vmem:[#allocation5 + $0x211] ss:$0 sm:$0xff]  ;;  %v2143_v37 = vpack.c.bf16 %v2139_v36, %v2138_v35  ;;  %v2345_v38 = vld [vmem:[#allocation5 + $0x238] ss:$0 sm:$0xff] }
0x1728   :  { %v1966_v40 = vmul.f32 0.5, %v1964_v39 }
0x172a   :  { %v1968_v61 = vmul.f32 %v1966_v40, %v1948_v26 }
0x172c   :  { %v1977_v42 = vpack.c.bf16 %v1968_v61, %v1967_v41 }
0x172e   :  { %2647 = vmatmul.mubr.msk.bf16.vlgmr.msra.gmra.mxu1 %vm1052_vm7, %v1977_v42 }
0x17ee   :  { %v2024_v44 = vpop.f32.mrf.mxu1 }
0x17ef   :  { %v2025_v59 = vadd.f32 %v2341_v43, %v2024_v44 }
0x17f0   :  { %v2648_v62 = vpop.f32.mrf.mxu1 }
0x17f1   :  { %v2031_v45 = vadd.f32 %v2025_v59, %v1893_v6  ;;  %v2075_v6 = vld [vmem:[#allocation5 + $0x228] sm:$0xff]  ;;  %v2347_v59 = vld [vmem:[#allocation5 + $0x239] ss:$0 sm:$0xff] }
0x17f2   :  { %v2027_v46 = vpop.f32.mrf.mxu1  ;;  %v2080_v4 = vpack.c.bf16 %v2076_v7, %v2075_v6  ;;  %v2193_v7 = vld [vmem:[#allocation2] sm:$0x3] }
0x17f3   :  { %v2028_v47 = vadd.f32 %v2341_v43, %v2027_v46  ;;  %v2035_v48 = vsel %vm64_vm3, %v2031_v45, 0.0 }
0x17f4   :  { %2036 = vadd.xlane.f32.xlu1 %v2035_v48  ;;  %v2649_v49 = vpop.f32.mrf.mxu1  ;;  %2651 = vmatpush3.bf16.msra.mxu0 %v2080_v4 }
0x17f5   :  { %v2032_v50 = vadd.f32 %v2028_v47, %v1894_v29  ;;  %v2073_v29 = vld [vmem:[#allocation5 + $0x218] sm:$0xff]  ;;  %2652 = vmatprep.subr.bf16.mxu0 %v2825_v1 }
0x17f6   :  { %v2079_v9 = vpack.c.bf16 %v2074_v8, %v2073_v29  ;;  %v2832_v29 = vmov 17  }
0x17f7   :  { %v2038_v52 = vsel %vm64_vm3, %v2032_v50, 0.0  ;;  %2682 = vset.pattern.permute.xlu1 %v2832_v29 }
0x17f8   :  { %2039 = vadd.xlane.f32.xlu0 %v2038_v52  ;;  %2653 = vmatpush3.bf16.msra.mxu0 %v2079_v9 }
0x17f9   :  { %2658 = vmatprep.subr.bf16.mxu0 %v2825_v1 }
0x187d   :  { %v2037_v53 = vpop.xlane.xlu1 %2036 }
0x187e   :  { %v2041_v54 = vmul.f32 0.03125, %v2037_v53 }
0x1880   :  { %v2043_v55 = vsub.f32 %v2031_v45, %v2041_v54 }
0x1881   :  { %v2040_v56 = vpop.xlane.xlu0 %2039 }
0x1882   :  { %v2042_v58 = vmul.f32 0.03125, %v2040_v56  ;;  %v2045_v63 = vmul.f32 %v2043_v55, %v2043_v55 }
0x1884   :  { %v2044_v60 = vsub.f32 %v2032_v50, %v2042_v58  ;;  %v2047_v0 = vsel %vm64_vm3, %v2045_v63, 0.0 }
0x1885   :  { %2048 = vadd.xlane.f32.xlu1 %v2047_v0 }
0x1886   :  { %v2046_v2 = vmul.f32 %v2044_v60, %v2044_v60 }
0x1888   :  { %v2050_v3 = vsel %vm64_vm3, %v2046_v2, 0.0 }
0x1889   :  { %2051 = vadd.xlane.f32.xlu0 %v2050_v3 }
0x190e   :  { %v2049_v12 = vpop.xlane.xlu1 %2048 }
0x190f   :  { %v2053_v13 = vmul.f32 0.03125, %v2049_v12 }
0x1911   :  { %v2055_v5 = vadd.f32 1e-12, %v2053_v13 }
0x1912   :  { %v2052_v14 = vpop.xlane.xlu0 %2051 }
0x1913   :  { %2740 = vrsqrt.f32 %v2055_v5  ;;  %v2054_v33 = vmul.f32 0.03125, %v2052_v14 }
0x1915   :  { %v2056_v15 = vadd.f32 1e-12, %v2054_v33 }
0x1917   :  { %2742 = vrsqrt.f32 %v2056_v15 }
0x1920   :  { %v2741_v16 = vpop.eup %2740 }
0x1921   :  { %v2059_v18 = vmul.f32 %v2741_v16, %v2043_v55  ;;  %v2830_v55 = vmov 16  }
0x1922   :  { %2681 = vset.pattern.permute.xlu0 %v2830_v55 }
0x1923   :  { %v2065_v19 = vmul.f32 %v2343_v17, %v2059_v18 }
0x1924   :  { %v2743_v20 = vpop.eup %2742 }
0x1925   :  { %v2060_v22 = vmul.f32 %v2743_v20, %v2044_v60  ;;  %v2071_v24 = vadd.f32 %v2344_v21, %v2065_v19 }
0x1927   :  { %v2066_v23 = vmul.f32 %v2343_v17, %v2060_v22  ;;  %v2077_v26 = vpack.c.bf16 %v2071_v24, %v2071_v24 }
0x1929   :  { %v2072_v25 = vadd.f32 %v2344_v21, %v2066_v23  ;;  %v2088_v28 = vunpack.c.l.b16 %v2077_v26 }
0x192b   :  { %v2078_v57 = vpack.c.bf16 %v2072_v25, %v2072_v25 }
0x192d   :  { %v2089_v27 = vunpack.c.l.b16 %v2078_v57 }
0x192f   :  { %v2090_v30 = vrot.slane %v2089_v27, 7 }
0x1931   :  { %v2092_v32 = vsel %vm2091_vm8, %v2090_v30, %v2088_v28 }
0x1932   :  { %v2093_v51 = vpack.c.b16 %v2092_v32, %v2092_v32 }
0x1934   :  { %2655 = vmatmul.mubr.msk.bf16.vlgmr.msra.gmra.mxu0 %vm64_vm3, %v2093_v51 }
0x1935   :  { %2662 = vmatprep.mubr.msk.bf16.mxu0 %vm2826_vm0, %v2825_v1  ;;  %2659 = vmatpush3.bf16.msra.mxu0 %v2144_v34 }
0x1936   :  { %2660 = vmatprep.subr.bf16.mxu0 %v2825_v1 }
0x1939   :  { %2661 = vmatpush3.bf16.msra.mxu0 %v2143_v37 }
0x19f4   :  { %v2131_v39 = vpop.f32.mrf.mxu0 }
0x19f5   :  { %v2132_v40 = vadd.f32 %v2345_v38, %v2131_v39 }
0x19f6   :  { %v2656_v41 = vpop.f32.mrf.mxu0 }
0x19f7   :  { %2744 = vtanh.f32 %v2132_v40 }
0x19f8   :  { %v2134_v61 = vpop.f32.mrf.mxu0 }
0x19fa   :  { %v2657_v42 = vpop.f32.mrf.mxu0 }
0x1a04   :  { %v2745_v43 = vpop.eup %2744 }
0x1a05   :  { %v2142_v44 = vpack.c.bf16 %v2745_v43, %v2745_v43 }
0x1a07   :  { %2663 = vmatmul.mubr.msk.bf16.vlgmr.msra.gmra.mxu0 %vm64_vm3, %v2142_v44 }
0x1ac7   :  { %v2187_v62 = vpop.f32.mrf.mxu0 }
0x1ac8   :  { %v3134_v45 = vadd.f32 %v2347_v59, %v2187_v62 }
0x1ac9   :  { %v2664_v46 = vpop.f32.mrf.mxu0 }
0x1aca   :  { %v2229_v47 = vsel %vm2228_vm9, %v3134_v45, -inf  ;;  %v2195_v50 = vsel %vm2194_vm10, %v3134_v45, -inf }
0x1acb   :  { %2230 = vmax.xlane.f32.xlu0 %v2229_v47  ;;  %v2190_v48 = vpop.f32.mrf.mxu0 }
0x1acd   :  { %v2665_v49 = vpop.f32.mrf.mxu0 }
0x1acf   :  { %2196 = vmax.xlane.f32.xlu0 %v2195_v50 }
0x1b54   :  { %v2231_v52 = vpop.xlane.xlu0 %2230 }
0x1b55   :  { %v2232_v53 = vsub.f32 %v3134_v45, %v2231_v52 }
0x1b57   :  { %v2233_v54 = vmul.f32 1.442695, %v2232_v53 }
0x1b58   :  { %v2197_v58 = vpop.xlane.xlu0 %2196 }
0x1b59   :  { %2746 = vpow2.f32 %v2233_v54  ;;  %v2198_v63 = vsub.f32 %v3134_v45, %v2197_v58 }
0x1b5b   :  { %v2199_v60 = vmul.f32 1.442695, %v2198_v63 }
0x1b5d   :  { %2748 = vpow2.f32 %v2199_v60 }
0x1b66   :  { %v2747_v56 = vpop.eup %2746 }
0x1b67   :  { %2236 = vrot.lane.b32.xlu1 %v2747_v56, %s2831_s21 }
0x1b6a   :  { %v2749_v3 = vpop.eup %2748 }
0x1b6b   :  { %v2201_v6 = vsel %vm2194_vm10, %v2749_v3, 0.0  ;;  %2248 = vperm.xlu1 %2682, %v2193_v7  }
0x1bd9   :  { %v2237_v0 = vpop.permute.xlu1 %2236 }
0x1bda   :  { %v2240_v2 = vsel %vm2239_vm11, %v2237_v0, 0.0 }
0x1bdb   :  { %2241 = vadd.xlane.f32.xlu0 %v2240_v2 }
0x1bdf   :  { %2202 = vadd.xlane.f32.xlu0 %v2201_v6 }
0x1be6   :  { %v2249_v21 = vpop.permute.xlu1 %2248 }
0x1be7   :  { %vm2250_vm13 = vcmp.eq.s32.totalorder %v2249_v21, %v2864_v11 }
0x1be8   :  { %v2350_v22 = vsel %vm2250_vm13, 1.0, %v2825_v1 }
0x1bf5   :  { %2209 = vperm.xlu0 %2681, %v2193_v7  }
0x1bf9   :  { %2683 = vset.pattern.permute.xlu0 %v2832_v29 }
0x1c64   :  { %v2242_v4 = vpop.xlane.xlu0 %2241 }
0x1c65   :  { %2750 = vlog2.f32 %v2242_v4 }
0x1c68   :  { %v2203_v5 = vpop.xlane.xlu0 %2202 }
0x1c69   :  { %2752 = vlog2.f32 %v2203_v5 }
0x1c70   :  { %v2210_v15 = vpop.permute.xlu0 %2209 }
0x1c71   :  { %vm2211_vm12 = vcmp.eq.s32.totalorder %v2210_v15, %v2864_v11 }
0x1c72   :  { %v2751_v8 = vpop.eup %2750  ;;  %v2349_v18 = vsel %vm2211_vm12, 1.0, %v2825_v1 }
0x1c73   :  { %v2244_v9 = vmul.f32 0.6931472, %v2751_v8 }
0x1c75   :  { %v2245_v12 = vadd.f32 %v2244_v9, %v2231_v52 }
0x1c76   :  { %v2753_v14 = vpop.eup %2752 }
0x1c77   :  { %v2246_v13 = vsub.f32 %v3134_v45, %v2245_v12  ;;  %v2205_v33 = vmul.f32 0.6931472, %v2753_v14 }
0x1c79   :  { %2254 = vrot.lane.b32.xlu1 %v2246_v13, %s2831_s21  ;;  %v2206_v16 = vadd.f32 %v2205_v33, %v2197_v58 }
0x1c7b   :  { %v2207_v17 = vsub.f32 %v3134_v45, %v2206_v16 }
0x1c7d   :  { %v2214_v19 = vmul.f32 %v2349_v18, %v2207_v17 }
0x1c7f   :  { %v2215_v20 = vsel %vm2194_vm10, %v2214_v19, 0.0 }
0x1c9d   :  { %2216 = vadd.xlane.f32.xlu1 %v2215_v20 }
0x1ceb   :  { %v2255_v23 = vpop.permute.xlu1 %2254 }
0x1cec   :  { %v2257_v24 = vmul.f32 %v2350_v22, %v2255_v23 }
0x1cee   :  { %v2258_v25 = vsel %vm2239_vm11, %v2257_v24, 0.0 }
0x1cef   :  { %2259 = vadd.xlane.f32.xlu0 %v2258_v25 }
0x1d26   :  { %v2217_v26 = vpop.xlane.xlu1 %2216 }
0x1d27   :  { %v2218_v57 = vsub.f32 0.0, %v2217_v26 }
0x1d29   :  { %v2220_v27 = vsel %vm2219_vm14, %v2218_v57, 0.0 }
0x1d2a   :  { %v2221_v28 = vrot.slane %v2220_v27, 4 }
0x1d2c   :  { %v2222_v30 = vadd.f32 %v2221_v28, %v2220_v27 }
0x1d2e   :  { %v2223_v32 = vrot.slane %v2222_v30, 2 }
0x1d30   :  { %v2224_v11 = vadd.f32 %v2223_v32, %v2222_v30 }
0x1d32   :  { %v2225_v35 = vrot.slane %v2224_v11, 1 }
0x1d34   :  { %v2226_v38 = vadd.f32 %v2225_v35, %v2224_v11 }
0x1d36   :  { %v2227_v41 = vmul.f32 0.5, %v2226_v38 }
0x1d78   :  { %v2260_v51 = vpop.xlane.xlu0 %2259 }
0x1d79   :  { %v2261_v10 = vsub.f32 0.0, %v2260_v51 }
0x1d7b   :  { %v2262_v31 = vsel %vm2219_vm14, %v2261_v10, 0.0 }
0x1d7c   :  { %v2263_v34 = vrot.slane %v2262_v31, 4 }
0x1d7e   :  { %v2264_v1 = vadd.f32 %v2263_v34, %v2262_v31 }
0x1d80   :  { %v2265_v36 = vrot.slane %v2264_v1, 2 }
0x1d82   :  { %v2266_v37 = vadd.f32 %v2265_v36, %v2264_v1 }
0x1d84   :  { %v2267_v39 = vrot.slane %v2266_v37, 1 }
0x1d86   :  { %v2268_v40 = vadd.f32 %v2267_v39, %v2266_v37 }
0x1d88   :  { %v2269_v61 = vmul.f32 0.5, %v2268_v40 }
0x1d8a   :  { %v2270_v42 = vadd.f32 %v2269_v61, %v2227_v41 }
0x1d8c   :  { %v2271_v43 = vsel %vm2219_vm14, %v3134_v45, %v2270_v42 }
0x1d8d   :  { %2272 = vst [vmem:[#allocation7] sm:$0xff] %v2271_v43 }
0x1d8e   :  { %2805 = shalt.err (!%p2802_p0)
}
0x1d8f   :  { %2282 = dma.vmem_to_hbm [thread:$0]  %s2280_s23, 128, %s3160_s2, [#allocation4]  }
0x1d90   :  { %2818 = dma.done.wait [#allocation4], 128  }
0x1d91   :  { %2819 = vsyncadd [#allocation4], 4294967168 }
0x1d92   :  { %2286 = vsyncpa [#allocation3], 1 }
0x1d93   :  { %2287 = vsyncpa [#allocation6], 1 }
0x1d94   :  { %2288 = vsyncpa [#allocation4], 1 }

</bundles_post_ra>
